<compile_context>
chip_gen: v7x
topology: tpu7x:2x2x1
jax: 0.10.0
libtpu: 0.0.40
codegen_flags: <defaults>
</compile_context>

<pallas_src>
import numpy as np

import jax
import jax.numpy as jnp
from jax.experimental import pallas as pl
from jax.experimental.pallas import tpu as pltpu

CONV_CFG = [(32, 8, 4), (64, 4, 2), (64, 3, 1)]     # (C_out, kernel, stride)
HIDDEN = 512
S2D = 4                                             # space-to-depth factor == conv1 stride


def _cdiv(a, b):
    return -(-a // b)


# ---------------------------------------------------------------------------
# Fused Pallas kernel
# ---------------------------------------------------------------------------
def _fused_termination_kernel(xs_ref, w1a_ref, w1b_ref, b1_ref, w2_ref, b2_ref,
                              w3_ref, b3_ref, wh1_ref, bh1_ref, wh2_ref, bh2_ref,
                              o_ref,
                              h1_scr, p2_scr, h2_scr, hd_scr):
    bt = o_ref.shape[0]                      # batch tile (multiple of 8)
    f32 = jnp.float32

    # ---- conv1: 8x8 stride-4 == 2x2 stride-1 on the space-to-depth input ----------
    # Row-lowered over x at pack time: each vertical tap is ONE whole-tile matmul.
    # xs rows are ordered (s2d row y, batch): rows [0:8bt] are y=0..7, [bt:9bt] y=1..8.
    h1 = jnp.dot(xs_ref[0:8 * bt, :], w1a_ref[...], preferred_element_type=f32)
    h1 = h1 + jnp.dot(xs_ref[bt:9 * bt, :], w1b_ref[...], preferred_element_type=f32)
    h1_scr[...] = jnp.maximum(h1 + b1_ref[...], 0.0).astype(h1_scr.dtype)   # (8bt, 256)

    # ---- conv2: 4x4 stride-2, row-lowered over x -----------------------------------
    # Patch rows are (y2, batch); each of the 12 copies is a dense (bt, 256) slab.
    c1x = h1_scr.shape[-1]
    for y2 in range(3):
        for ki in range(4):
            src = (2 * y2 + ki) * bt
            p2_scr[y2 * bt:(y2 + 1) * bt, ki * c1x:(ki + 1) * c1x] = \
                h1_scr[src:src + bt, :]
    h2 = jnp.dot(p2_scr[...], w2_ref[...], preferred_element_type=f32)
    h2_scr[...] = jnp.maximum(h2 + b2_ref[...], 0.0).astype(h2_scr.dtype)   # (3bt, 256)

    # ---- conv3: 3x3 stride-1 -> 1x1: tap-accumulate over the 3 kernel rows ---------
    feat = jnp.dot(h2_scr[0:bt, :], w3_ref[0], preferred_element_type=f32)
    feat = feat + jnp.dot(h2_scr[bt:2 * bt, :], w3_ref[1], preferred_element_type=f32)
    feat = feat + jnp.dot(h2_scr[2 * bt:3 * bt, :], w3_ref[2], preferred_element_type=f32)
    feat = jnp.maximum(feat + b3_ref[...], 0.0)                             # (bt, 128)

    # ---- dueling NoisyLinear head ---------------------------------------------------
    # Value+advantage first layers fused into one matmul; both second layers fused into
    # one block-diagonal matmul: output col 0 = value, cols 1..A = advantage.
    hh = jnp.dot(feat.astype(hd_scr.dtype), wh1_ref[...], preferred_element_type=f32)
    hd_scr[...] = jnp.maximum(hh + bh1_ref[...], 0.0).astype(hd_scr.dtype)  # (bt, 1024)
    va = jnp.dot(hd_scr[...], wh2_ref[...], preferred_element_type=f32) + bh2_ref[...]

    num_a = o_ref.shape[-1]
    v = va[:, 0:1]
    adv = va[:, 1:1 + num_a]
    q = v + (adv - jnp.mean(adv, axis=-1, keepdims=True))
    o_ref[...] = jax.nn.sigmoid(q).astype(o_ref.dtype)


# ---------------------------------------------------------------------------
# Glue: batch tiling, layout plumbing, pallas_call
# ---------------------------------------------------------------------------
def _pick_batch_tile(batch):
    b8 = 8 * _cdiv(batch, 8)
    if b8 <= 8:
        return 8
    # keep the grid >= 2 steps whenever batch >= 16 (v7x has two TensorCores)
    return max(8, min(64, 8 * (b8 // 16)))


def termination_network_forward(x, packed, *, num_options):
    """x: (B, C, 36, 36) NCHW f32; packed: kernel-ready parameter dict."""
    B, C, H, W = x.shape
    if (H, W) != (36, 36):
        # TODO(synk): kernel is specialized to 36x36 inputs (9x9 space-to-depth grid);
        # other spatial sizes need re-lowered weights.
        raise ValueError("fused kernel is specialized to 36x36 spatial inputs")

    K1P = packed["w1a"].shape[0]          # padded lane width of one s2d row band
    C1X = packed["w1a"].shape[1]          # 8 * 32
    N2P = packed["w2"].shape[1]           # 256
    HID2 = packed["wh1"].shape[1]         # 2 * 512
    A = num_options
    assert packed["wh2"].shape[1] >= 1 + A

    bt = _pick_batch_tile(B)
    grid_n = _cdiv(B, bt)
    Bp = grid_n * bt

    # One-time layout plumbing in XLA: NCHW -> space-to-depth (stride-4 blocks folded
    # into depth) -> rows ordered (grid step, s2d row, batch-in-tile), 128-lane padded.
    K1 = 9 * 16 * C
    xh = jnp.transpose(x, (0, 2, 3, 1))                               # (B, 36, 36, C)
    xs = xh.reshape(B, 9, S2D, 9, S2D, C).transpose(0, 1, 3, 2, 4, 5)
    xs = xs.reshape(B, 9, K1)
    xs = jnp.pad(xs, ((0, Bp - B), (0, 0), (0, K1P - K1)))
    xs = xs.reshape(grid_n, bt, 9, K1P).transpose(0, 2, 1, 3)
    xs = xs.reshape(grid_n * 9 * bt, K1P).astype(jnp.bfloat16)

    weight_keys = ("w1a", "w1b", "b1", "w2", "b2", "w3", "b3",
                   "wh1", "bh1", "wh2", "bh2")
    weights = [packed[k] for k in weight_keys]

    def _const_map(nd):
        return lambda i: (0,) * nd

    in_specs = [pl.BlockSpec((9 * bt, K1P), lambda i: (i, 0))]
    in_specs += [pl.BlockSpec(w.shape, _const_map(w.ndim)) for w in weights]
    out_specs = pl.BlockSpec((bt, A), lambda i: (i, 0))

    scratch_defs = [
        ((8 * bt, C1X), jnp.bfloat16),      # conv1 activations
        ((3 * bt, 4 * C1X), jnp.bfloat16),  # conv2 lowered patches
        ((3 * bt, N2P), jnp.bfloat16),      # conv2 activations
        ((bt, HID2), jnp.bfloat16),         # fused head hidden layer
    ]
    scratch_shapes = [pltpu.VMEM(s, d) for s, d in scratch_defs]

    def _nb(shape, dtype):
        return int(np.prod(shape)) * np.dtype(dtype).itemsize

    live_bytes = (2 * _nb((9 * bt, K1P), jnp.bfloat16)                # double-buffered input
                  + 2 * sum(_nb(w.shape, w.dtype) for w in weights)   # default 2x buffering
                  + 2 * _nb((bt, A), jnp.float32)
                  + sum(_nb(s, d) for s, d in scratch_defs))
    vmem_limit = int(min(live_bytes + (16 << 20), 64 << 20))          # + compiler temps

    out = pl.pallas_call(
        _fused_termination_kernel,
        out_shape=jax.ShapeDtypeStruct((Bp, A), jnp.float32),
        grid=(grid_n,),
        in_specs=in_specs,
        out_specs=out_specs,
        scratch_shapes=scratch_shapes,
        compiler_params=pltpu.CompilerParams(
            dimension_semantics=("parallel",),
            vmem_limit_bytes=vmem_limit),
    )(xs, *weights)
    return out[:B]


# ---------------------------------------------------------------------------
# Parameter construction (matches the PyTorch module's init + training-mode noise)
# ---------------------------------------------------------------------------
def conv_weight_init(key, c_out, c_in, k):
    """Orthogonal init with ReLU gain (nn.init.orthogonal_, gain=sqrt(2))."""
    gain = float(np.sqrt(2.0))
    rows, cols = c_out, c_in * k * k
    a = jax.random.normal(key, (rows, cols), dtype=jnp.float32)
    transposed = rows < cols
    if transposed:
        a = a.T
    q, r = jnp.linalg.qr(a)
    q = q * jnp.sign(jnp.diag(r))
    if transposed:
        q = q.T
    return (gain * q).reshape(c_out, c_in, k, k).astype(jnp.float32)


def noisy_linear_params(key, in_f, out_f, std_init=0.5, min_sigma=1e-3):
    """Effective training-mode NoisyLinear params: W (out,in), b (out,)."""
    k1, k2, k3, k4 = jax.random.split(key, 4)
    mu_range = 3.0 / np.sqrt(in_f)
    w_mu = jax.random.uniform(k1, (out_f, in_f), jnp.float32, -mu_range, mu_range)
    b_mu = jax.random.uniform(k2, (out_f,), jnp.float32, -mu_range, mu_range)
    w_sigma = jnp.full((out_f, in_f), std_init / np.sqrt(in_f), jnp.float32)
    b_sigma = jnp.full((out_f,), std_init / np.sqrt(out_f), jnp.float32)

    def scale_noise(k, n):
        v = jax.random.normal(k, (n,), jnp.float32)
        return jnp.sign(v) * jnp.sqrt(jnp.abs(v))

    eps_in = scale_noise(k3, in_f)
    eps_out = scale_noise(k4, out_f)
    w = w_mu + jnp.maximum(w_sigma, min_sigma) * jnp.outer(eps_out, eps_in)
    b = b_mu + jnp.maximum(b_sigma, min_sigma) * eps_out
    return w.astype(jnp.float32), b.astype(jnp.float32)


def make_params(key, state_shape, num_options):
    C, H, W = state_shape
    keys = jax.random.split(key, 7)
    convs = []
    c_in, h, w = C, H, W
    for idx, (c_out, k, s) in enumerate(CONV_CFG):
        convs.append((conv_weight_init(keys[idx], c_out, c_in, k),
                      jnp.zeros((c_out,), jnp.float32)))     # conv bias is zero-init
        h = (h - k) // s + 1
        w = (w - k) // s + 1
        c_in = c_out
    feat = c_in * h * w
    value = [noisy_linear_params(keys[3], feat, HIDDEN),
             noisy_linear_params(keys[4], HIDDEN, 1)]
    adv = [noisy_linear_params(keys[5], feat, HIDDEN),
           noisy_linear_params(keys[6], HIDDEN, num_options)]
    return {"convs": convs, "value": value, "adv": adv}


def pack_params(params):
    """Build kernel-ready lowered/fused weights (bf16) and lane-padded biases (f32)."""
    (w1, b1), (w2, b2), (w3, b3) = params["convs"]
    (wv1, bv1), (wv2, bv2) = params["value"]
    (wa1, ba1), (wa2, ba2) = params["adv"]
    w1, b1, w2, b2, w3, b3 = map(np.asarray, (w1, b1, w2, b2, w3, b3))
    wv1, bv1, wv2, bv2 = map(np.asarray, (wv1, bv1, wv2, bv2))
    wa1, ba1, wa2, ba2 = map(np.asarray, (wa1, ba1, wa2, ba2))

    C1, Cin = w1.shape[0], w1.shape[1]
    C2, C3 = w2.shape[0], w3.shape[0]
    D = 16 * Cin                     # space-to-depth depth
    K1 = 9 * D
    K1P = 128 * _cdiv(K1, 128)
    C1X = 8 * C1                     # 256
    N2 = 3 * C2                      # 192
    N2P = 128 * _cdiv(N2, 128)       # 256
    FP = 128 * _cdiv(C3, 128)        # 128
    HID = wv1.shape[0]
    A = wa2.shape[0]
    NOUT = 128 * _cdiv(1 + A, 128)

    # conv1 -> two row-lowered (K1P, 8*C1) matrices, one per vertical 2x2 tap di.
    # w1k[di, dj, (p*4+q)*Cin+c, co] = w1[co, c, 4*di+p, 4*dj+q]
    w1k = w1.reshape(C1, Cin, 2, 4, 2, 4).transpose(2, 4, 3, 5, 1, 0).reshape(2, 2, D, C1)
    w1low = np.zeros((2, 9, D, 8, C1), np.float32)
    for di in range(2):
        for dj in range(2):
            for x1 in range(8):
                w1low[di, x1 + dj, :, x1, :] = w1k[di, dj]
    w1low = np.pad(w1low.reshape(2, K1, C1X), ((0, 0), (0, K1P - K1), (0, 0)))

    # conv2 -> row-lowered (4*8*C1, 3*C2) matrix; output cols (x2, c2), padded to 256.
    w2t = w2.transpose(2, 3, 1, 0)                          # (ki, kj, ci, co)
    w2low = np.zeros((4, 8, C1, 3, C2), np.float32)
    for x2 in range(3):
        for kj in range(4):
            w2low[:, 2 * x2 + kj, :, x2, :] = w2t[:, kj, :, :]
    w2low = np.pad(w2low.reshape(4 * C1X, N2), ((0, 0), (0, N2P - N2)))

    # conv3 -> 3 per-kernel-row tap matrices (N2P, FP).
    w3t = w3.transpose(2, 3, 1, 0).reshape(3, N2, C3)       # (ki, kj*C2+ci, co)
    w3t = np.pad(w3t, ((0, 0), (0, N2P - N2), (0, FP - C3)))
    b3p = np.pad(b3, (0, FP - C3))

    # dueling head: fused first layer (FP, 2*HID); block-diagonal second layer.
    wh1 = np.zeros((FP, 2 * HID), np.float32)
    wh1[:C3, :HID] = wv1.T
    wh1[:C3, HID:] = wa1.T
    bh1 = np.concatenate([bv1, ba1])
    wh2 = np.zeros((2 * HID, NOUT), np.float32)
    wh2[:HID, 0] = wv2.reshape(-1)
    wh2[HID:, 1:1 + A] = wa2.T
    bh2 = np.zeros((NOUT,), np.float32)
    bh2[0] = float(bv2.reshape(-1)[0])
    bh2[1:1 + A] = ba2

    bf16, f32 = jnp.bfloat16, jnp.float32

    def _row(v):
        return jnp.asarray(v, f32).reshape(1, -1)

    return {
        "w1a": jnp.asarray(w1low[0], bf16),
        "w1b": jnp.asarray(w1low[1], bf16),
        "b1": _row(np.tile(b1, 8)),
        "w2": jnp.asarray(w2low, bf16),
        "b2": _row(np.pad(np.tile(b2, 3), (0, N2P - N2))),
        "w3": jnp.asarray(w3t, bf16),
        "b3": _row(b3p),
        "wh1": jnp.asarray(wh1, bf16),
        "bh1": _row(bh1),
        "wh2": jnp.asarray(wh2, bf16),
        "bh2": _row(bh2),
    }


# ---------------------------------------------------------------------------
# Pure-JAX reference (f32) for a sanity check
# ---------------------------------------------------------------------------
def _reference_forward(x, params):
    def conv(h, w, b, s):
        y = jax.lax.conv_general_dilated(
            h, w, window_strides=(s, s), padding="VALID",
            dimension_numbers=("NCHW", "OIHW", "NCHW"))
        return jax.nn.relu(y + b.reshape(1, -1, 1, 1))

    (w1, b1), (w2, b2), (w3, b3) = params["convs"]
    h = conv(conv(conv(x, w1, b1, 4), w2, b2, 2), w3, b3, 1)
    feat = h.reshape(h.shape[0], -1)
    (wv1, bv1), (wv2, bv2) = params["value"]
    (wa1, ba1), (wa2, ba2) = params["adv"]
    hv = jax.nn.relu(feat @ wv1.T + bv1)
    v = hv @ wv2.T + bv2
    ha = jax.nn.relu(feat @ wa1.T + ba1)
    a = ha @ wa2.T + ba2
    q = v + (a - a.mean(axis=1, keepdims=True))
    return jax.nn.sigmoid(q)


# ---------------------------------------------------------------------------
if __name__ == "__main__":
    key = jax.random.PRNGKey(0)
    k_params, k_x = jax.random.split(key)

    C, H, W = 4, 36, 36                 # conv stack: 36 -> 8 -> 3 -> 1, feat = 64
    num_options = 8

    params = make_params(k_params, (C, H, W), num_options)
    packed = pack_params(params)

    fwd = jax.jit(termination_network_forward, static_argnames=("num_options",))

    # batch=2 exercises the single-step grid; batch=10 exercises grid=2 + batch padding
    for batch in (2, 10):
        xb = jax.random.normal(jax.random.fold_in(k_x, batch),
                               (batch, C, H, W), dtype=jnp.float32)
        out = jax.block_until_ready(fwd(xb, packed, num_options=num_options))
        assert out.shape == (batch, num_options), out.shape
        assert bool(jnp.all((out >= 0.0) & (out <= 1.0)))          # sigmoid range
        ref = jax.block_until_ready(_reference_forward(xb, params))
        err = float(jnp.max(jnp.abs(out - ref)))
        assert err < 6e-2, err                                     # loose (bf16 matmuls)

    print("KERNEL_OK")
</pallas_src>

<mosaic_0001>
module attributes {stable_mosaic.version = 11 : i64} {
  func.func @_fused_termination_kernel(%arg0: i32, %arg1: memref<72x640xbf16, #tpu.memory_space<vmem>>, %arg2: memref<640x256xbf16, #tpu.memory_space<vmem>>, %arg3: memref<640x256xbf16, #tpu.memory_space<vmem>>, %arg4: memref<1x256xf32, #tpu.memory_space<vmem>>, %arg5: memref<1024x256xbf16, #tpu.memory_space<vmem>>, %arg6: memref<1x256xf32, #tpu.memory_space<vmem>>, %arg7: memref<3x256x128xbf16, #tpu.memory_space<vmem>>, %arg8: memref<1x128xf32, #tpu.memory_space<vmem>>, %arg9: memref<128x1024xbf16, #tpu.memory_space<vmem>>, %arg10: memref<1x1024xf32, #tpu.memory_space<vmem>>, %arg11: memref<1024x128xbf16, #tpu.memory_space<vmem>>, %arg12: memref<1x128xf32, #tpu.memory_space<vmem>>, %arg13: memref<8x8xf32, #tpu.memory_space<vmem>>, %arg14: memref<64x256xbf16, #tpu.memory_space<vmem>>, %arg15: memref<24x1024xbf16, #tpu.memory_space<vmem>>, %arg16: memref<24x256xbf16, #tpu.memory_space<vmem>>, %arg17: memref<8x1024xbf16, #tpu.memory_space<vmem>>) attributes {dimension_semantics = [#tpu.dimension_semantics<parallel>], iteration_bounds = array<i64: 1>, scalar_prefetch = 0 : i64, scratch_operands = 4 : i64, tpu.core_type = #tpu.core_type<tc>, window_params = [{transform_indices = @transform_0, window_bounds = array<i64: 72, 640>}, {pipeline_mode = #tpu.pipeline_mode<synchronous>, transform_indices = @transform_1, window_bounds = array<i64: 640, 256>}, {pipeline_mode = #tpu.pipeline_mode<synchronous>, transform_indices = @transform_2, window_bounds = array<i64: 640, 256>}, {pipeline_mode = #tpu.pipeline_mode<synchronous>, transform_indices = @transform_3, window_bounds = array<i64: 1, 256>}, {pipeline_mode = #tpu.pipeline_mode<synchronous>, transform_indices = @transform_4, window_bounds = array<i64: 1024, 256>}, {pipeline_mode = #tpu.pipeline_mode<synchronous>, transform_indices = @transform_5, window_bounds = array<i64: 1, 256>}, {pipeline_mode = #tpu.pipeline_mode<synchronous>, transform_indices = @transform_6, window_bounds = array<i64: 3, 256, 128>}, {pipeline_mode = #tpu.pipeline_mode<synchronous>, transform_indices = @transform_7, window_bounds = array<i64: 1, 128>}, {pipeline_mode = #tpu.pipeline_mode<synchronous>, transform_indices = @transform_8, window_bounds = array<i64: 128, 1024>}, {pipeline_mode = #tpu.pipeline_mode<synchronous>, transform_indices = @transform_9, window_bounds = array<i64: 1, 1024>}, {pipeline_mode = #tpu.pipeline_mode<synchronous>, transform_indices = @transform_10, window_bounds = array<i64: 1024, 128>}, {pipeline_mode = #tpu.pipeline_mode<synchronous>, transform_indices = @transform_11, window_bounds = array<i64: 1, 128>}, {transform_indices = @transform_12, window_bounds = array<i64: 8, 8>}]} {
    %c0 = arith.constant 0 : index
    %c0_0 = arith.constant 0 : index
    %0 = vector.load %arg1[%c0, %c0_0] : memref<72x640xbf16, #tpu.memory_space<vmem>>, vector<64x640xbf16>
    %c0_1 = arith.constant 0 : index
    %c0_2 = arith.constant 0 : index
    %1 = vector.load %arg2[%c0_1, %c0_2] : memref<640x256xbf16, #tpu.memory_space<vmem>>, vector<640x256xbf16>
    %cst = arith.constant dense<0.000000e+00> : vector<64x256xf32>
    %2 = tpu.matmul %0, %1, %cst {dimension_numbers = #tpu.dot_dimension_numbers<[1], [0], [0], [1], [0, 0, 1, 1], [], []>} : vector<64x640xbf16>, vector<640x256xbf16>, vector<64x256xf32> -> vector<64x256xf32>
    %c8 = arith.constant 8 : index
    %c0_3 = arith.constant 0 : index
    %3 = vector.load %arg1[%c8, %c0_3] : memref<72x640xbf16, #tpu.memory_space<vmem>>, vector<64x640xbf16>
    %c0_4 = arith.constant 0 : index
    %c0_5 = arith.constant 0 : index
    %4 = vector.load %arg3[%c0_4, %c0_5] : memref<640x256xbf16, #tpu.memory_space<vmem>>, vector<640x256xbf16>
    %cst_6 = arith.constant dense<0.000000e+00> : vector<64x256xf32>
    %5 = tpu.matmul %3, %4, %cst_6 {dimension_numbers = #tpu.dot_dimension_numbers<[1], [0], [0], [1], [0, 0, 1, 1], [], []>} : vector<64x640xbf16>, vector<640x256xbf16>, vector<64x256xf32> -> vector<64x256xf32>
    %6 = arith.addf %2, %5 : vector<64x256xf32>
    %c0_7 = arith.constant 0 : index
    %c0_8 = arith.constant 0 : index
    %7 = vector.load %arg4[%c0_7, %c0_8] : memref<1x256xf32, #tpu.memory_space<vmem>>, vector<1x256xf32>
    %8 = vector.broadcast %7 : vector<1x256xf32> to vector<64x256xf32>
    %9 = arith.addf %6, %8 : vector<64x256xf32>
    %cst_9 = arith.constant 0.000000e+00 : f32
    %10 = vector.broadcast %cst_9 : f32 to vector<64x256xf32>
    %11 = arith.maximumf %9, %10 : vector<64x256xf32>
    %12 = arith.truncf %11 : vector<64x256xf32> to vector<64x256xbf16>
    %c0_10 = arith.constant 0 : index
    %c0_11 = arith.constant 0 : index
    %13 = vector.load %arg14[%c0_10, %c0_11] : memref<64x256xbf16, #tpu.memory_space<vmem>>, vector<64x256xbf16>
    tpu.vector_store %arg14[%c0_10, %c0_11], %12 {strides = array<i32>} : memref<64x256xbf16, #tpu.memory_space<vmem>>, vector<64x256xbf16>,
    %c0_12 = arith.constant 0 : index
    %c0_13 = arith.constant 0 : index
    %14 = vector.load %arg14[%c0_12, %c0_13] : memref<64x256xbf16, #tpu.memory_space<vmem>>, vector<8x256xbf16>
    %c0_14 = arith.constant 0 : index
    %c0_15 = arith.constant 0 : index
    %15 = vector.load %arg15[%c0_14, %c0_15] : memref<24x1024xbf16, #tpu.memory_space<vmem>>, vector<8x256xbf16>
    tpu.vector_store %arg15[%c0_14, %c0_15], %14 {strides = array<i32>} : memref<24x1024xbf16, #tpu.memory_space<vmem>>, vector<8x256xbf16>,
    %c8_16 = arith.constant 8 : index
    %c0_17 = arith.constant 0 : index
    %16 = vector.load %arg14[%c8_16, %c0_17] : memref<64x256xbf16, #tpu.memory_space<vmem>>, vector<8x256xbf16>
    %c0_18 = arith.constant 0 : index
    %c256 = arith.constant 256 : index
    %17 = vector.load %arg15[%c0_18, %c256] : memref<24x1024xbf16, #tpu.memory_space<vmem>>, vector<8x256xbf16>
    tpu.vector_store %arg15[%c0_18, %c256], %16 {strides = array<i32>} : memref<24x1024xbf16, #tpu.memory_space<vmem>>, vector<8x256xbf16>,
    %c16 = arith.constant 16 : index
    %c0_19 = arith.constant 0 : index
    %18 = vector.load %arg14[%c16, %c0_19] : memref<64x256xbf16, #tpu.memory_space<vmem>>, vector<8x256xbf16>
    %c0_20 = arith.constant 0 : index
    %c512 = arith.constant 512 : index
    %19 = vector.load %arg15[%c0_20, %c512] : memref<24x1024xbf16, #tpu.memory_space<vmem>>, vector<8x256xbf16>
    tpu.vector_store %arg15[%c0_20, %c512], %18 {strides = array<i32>} : memref<24x1024xbf16, #tpu.memory_space<vmem>>, vector<8x256xbf16>,
    %c24 = arith.constant 24 : index
    %c0_21 = arith.constant 0 : index
    %20 = vector.load %arg14[%c24, %c0_21] : memref<64x256xbf16, #tpu.memory_space<vmem>>, vector<8x256xbf16>
    %c0_22 = arith.constant 0 : index
    %c768 = arith.constant 768 : index
    %21 = vector.load %arg15[%c0_22, %c768] : memref<24x1024xbf16, #tpu.memory_space<vmem>>, vector<8x256xbf16>
    tpu.vector_store %arg15[%c0_22, %c768], %20 {strides = array<i32>} : memref<24x1024xbf16, #tpu.memory_space<vmem>>, vector<8x256xbf16>,
    %c16_23 = arith.constant 16 : index
    %c0_24 = arith.constant 0 : index
    %22 = vector.load %arg14[%c16_23, %c0_24] : memref<64x256xbf16, #tpu.memory_space<vmem>>, vector<8x256xbf16>
    %c8_25 = arith.constant 8 : index
    %c0_26 = arith.constant 0 : index
    %23 = vector.load %arg15[%c8_25, %c0_26] : memref<24x1024xbf16, #tpu.memory_space<vmem>>, vector<8x256xbf16>
    tpu.vector_store %arg15[%c8_25, %c0_26], %22 {strides = array<i32>} : memref<24x1024xbf16, #tpu.memory_space<vmem>>, vector<8x256xbf16>,
    %c24_27 = arith.constant 24 : index
    %c0_28 = arith.constant 0 : index
    %24 = vector.load %arg14[%c24_27, %c0_28] : memref<64x256xbf16, #tpu.memory_space<vmem>>, vector<8x256xbf16>
    %c8_29 = arith.constant 8 : index
    %c256_30 = arith.constant 256 : index
    %25 = vector.load %arg15[%c8_29, %c256_30] : memref<24x1024xbf16, #tpu.memory_space<vmem>>, vector<8x256xbf16>
    tpu.vector_store %arg15[%c8_29, %c256_30], %24 {strides = array<i32>} : memref<24x1024xbf16, #tpu.memory_space<vmem>>, vector<8x256xbf16>,
    %c32 = arith.constant 32 : index
    %c0_31 = arith.constant 0 : index
    %26 = vector.load %arg14[%c32, %c0_31] : memref<64x256xbf16, #tpu.memory_space<vmem>>, vector<8x256xbf16>
    %c8_32 = arith.constant 8 : index
    %c512_33 = arith.constant 512 : index
    %27 = vector.load %arg15[%c8_32, %c512_33] : memref<24x1024xbf16, #tpu.memory_space<vmem>>, vector<8x256xbf16>
    tpu.vector_store %arg15[%c8_32, %c512_33], %26 {strides = array<i32>} : memref<24x1024xbf16, #tpu.memory_space<vmem>>, vector<8x256xbf16>,
    %c40 = arith.constant 40 : index
    %c0_34 = arith.constant 0 : index
    %28 = vector.load %arg14[%c40, %c0_34] : memref<64x256xbf16, #tpu.memory_space<vmem>>, vector<8x256xbf16>
    %c8_35 = arith.constant 8 : index
    %c768_36 = arith.constant 768 : index
    %29 = vector.load %arg15[%c8_35, %c768_36] : memref<24x1024xbf16, #tpu.memory_space<vmem>>, vector<8x256xbf16>
    tpu.vector_store %arg15[%c8_35, %c768_36], %28 {strides = array<i32>} : memref<24x1024xbf16, #tpu.memory_space<vmem>>, vector<8x256xbf16>,
    %c32_37 = arith.constant 32 : index
    %c0_38 = arith.constant 0 : index
    %30 = vector.load %arg14[%c32_37, %c0_38] : memref<64x256xbf16, #tpu.memory_space<vmem>>, vector<8x256xbf16>
    %c16_39 = arith.constant 16 : index
    %c0_40 = arith.constant 0 : index
    %31 = vector.load %arg15[%c16_39, %c0_40] : memref<24x1024xbf16, #tpu.memory_space<vmem>>, vector<8x256xbf16>
    tpu.vector_store %arg15[%c16_39, %c0_40], %30 {strides = array<i32>} : memref<24x1024xbf16, #tpu.memory_space<vmem>>, vector<8x256xbf16>,
    %c40_41 = arith.constant 40 : index
    %c0_42 = arith.constant 0 : index
    %32 = vector.load %arg14[%c40_41, %c0_42] : memref<64x256xbf16, #tpu.memory_space<vmem>>, vector<8x256xbf16>
    %c16_43 = arith.constant 16 : index
    %c256_44 = arith.constant 256 : index
    %33 = vector.load %arg15[%c16_43, %c256_44] : memref<24x1024xbf16, #tpu.memory_space<vmem>>, vector<8x256xbf16>
    tpu.vector_store %arg15[%c16_43, %c256_44], %32 {strides = array<i32>} : memref<24x1024xbf16, #tpu.memory_space<vmem>>, vector<8x256xbf16>,
    %c48 = arith.constant 48 : index
    %c0_45 = arith.constant 0 : index
    %34 = vector.load %arg14[%c48, %c0_45] : memref<64x256xbf16, #tpu.memory_space<vmem>>, vector<8x256xbf16>
    %c16_46 = arith.constant 16 : index
    %c512_47 = arith.constant 512 : index
    %35 = vector.load %arg15[%c16_46, %c512_47] : memref<24x1024xbf16, #tpu.memory_space<vmem>>, vector<8x256xbf16>
    tpu.vector_store %arg15[%c16_46, %c512_47], %34 {strides = array<i32>} : memref<24x1024xbf16, #tpu.memory_space<vmem>>, vector<8x256xbf16>,
    %c56 = arith.constant 56 : index
    %c0_48 = arith.constant 0 : index
    %36 = vector.load %arg14[%c56, %c0_48] : memref<64x256xbf16, #tpu.memory_space<vmem>>, vector<8x256xbf16>
    %c16_49 = arith.constant 16 : index
    %c768_50 = arith.constant 768 : index
    %37 = vector.load %arg15[%c16_49, %c768_50] : memref<24x1024xbf16, #tpu.memory_space<vmem>>, vector<8x256xbf16>
    tpu.vector_store %arg15[%c16_49, %c768_50], %36 {strides = array<i32>} : memref<24x1024xbf16, #tpu.memory_space<vmem>>, vector<8x256xbf16>,
    %c0_51 = arith.constant 0 : index
    %c0_52 = arith.constant 0 : index
    %38 = vector.load %arg15[%c0_51, %c0_52] : memref<24x1024xbf16, #tpu.memory_space<vmem>>, vector<24x1024xbf16>
    %c0_53 = arith.constant 0 : index
    %c0_54 = arith.constant 0 : index
    %39 = vector.load %arg5[%c0_53, %c0_54] : memref<1024x256xbf16, #tpu.memory_space<vmem>>, vector<1024x256xbf16>
    %cst_55 = arith.constant dense<0.000000e+00> : vector<24x256xf32>
    %40 = tpu.matmul %38, %39, %cst_55 {dimension_numbers = #tpu.dot_dimension_numbers<[1], [0], [0], [1], [0, 0, 1, 1], [], []>} : vector<24x1024xbf16>, vector<1024x256xbf16>, vector<24x256xf32> -> vector<24x256xf32>
    %c0_56 = arith.constant 0 : index
    %c0_57 = arith.constant 0 : index
    %41 = vector.load %arg6[%c0_56, %c0_57] : memref<1x256xf32, #tpu.memory_space<vmem>>, vector<1x256xf32>
    %42 = vector.broadcast %41 : vector<1x256xf32> to vector<24x256xf32>
    %43 = arith.addf %40, %42 : vector<24x256xf32>
    %cst_58 = arith.constant 0.000000e+00 : f32
    %44 = vector.broadcast %cst_58 : f32 to vector<24x256xf32>
    %45 = arith.maximumf %43, %44 : vector<24x256xf32>
    %46 = arith.truncf %45 : vector<24x256xf32> to vector<24x256xbf16>
    %c0_59 = arith.constant 0 : index
    %c0_60 = arith.constant 0 : index
    %47 = vector.load %arg16[%c0_59, %c0_60] : memref<24x256xbf16, #tpu.memory_space<vmem>>, vector<24x256xbf16>
    tpu.vector_store %arg16[%c0_59, %c0_60], %46 {strides = array<i32>} : memref<24x256xbf16, #tpu.memory_space<vmem>>, vector<24x256xbf16>,
    %c0_61 = arith.constant 0 : index
    %c0_62 = arith.constant 0 : index
    %48 = vector.load %arg16[%c0_61, %c0_62] : memref<24x256xbf16, #tpu.memory_space<vmem>>, vector<8x256xbf16>
    %c0_63 = arith.constant 0 : index
    %c0_64 = arith.constant 0 : index
    %c0_65 = arith.constant 0 : index
    %49 = vector.load %arg7[%c0_63, %c0_64, %c0_65] : memref<3x256x128xbf16, #tpu.memory_space<vmem>>, vector<1x256x128xbf16>
    %50 = vector.shape_cast %49 : vector<1x256x128xbf16> to vector<256x128xbf16>
    %cst_66 = arith.constant dense<0.000000e+00> : vector<8x128xf32>
    %51 = tpu.matmul %48, %50, %cst_66 {dimension_numbers = #tpu.dot_dimension_numbers<[1], [0], [0], [1], [0, 0, 1, 1], [], []>} : vector<8x256xbf16>, vector<256x128xbf16>, vector<8x128xf32> -> vector<8x128xf32>
    %c8_67 = arith.constant 8 : index
    %c0_68 = arith.constant 0 : index
    %52 = vector.load %arg16[%c8_67, %c0_68] : memref<24x256xbf16, #tpu.memory_space<vmem>>, vector<8x256xbf16>
    %c1 = arith.constant 1 : index
    %c0_69 = arith.constant 0 : index
    %c0_70 = arith.constant 0 : index
    %53 = vector.load %arg7[%c1, %c0_69, %c0_70] : memref<3x256x128xbf16, #tpu.memory_space<vmem>>, vector<1x256x128xbf16>
    %54 = vector.shape_cast %53 : vector<1x256x128xbf16> to vector<256x128xbf16>
    %cst_71 = arith.constant dense<0.000000e+00> : vector<8x128xf32>
    %55 = tpu.matmul %52, %54, %cst_71 {dimension_numbers = #tpu.dot_dimension_numbers<[1], [0], [0], [1], [0, 0, 1, 1], [], []>} : vector<8x256xbf16>, vector<256x128xbf16>, vector<8x128xf32> -> vector<8x128xf32>
    %56 = arith.addf %51, %55 : vector<8x128xf32>
    %c16_72 = arith.constant 16 : index
    %c0_73 = arith.constant 0 : index
    %57 = vector.load %arg16[%c16_72, %c0_73] : memref<24x256xbf16, #tpu.memory_space<vmem>>, vector<8x256xbf16>
    %c2 = arith.constant 2 : index
    %c0_74 = arith.constant 0 : index
    %c0_75 = arith.constant 0 : index
    %58 = vector.load %arg7[%c2, %c0_74, %c0_75] : memref<3x256x128xbf16, #tpu.memory_space<vmem>>, vector<1x256x128xbf16>
    %59 = vector.shape_cast %58 : vector<1x256x128xbf16> to vector<256x128xbf16>
    %cst_76 = arith.constant dense<0.000000e+00> : vector<8x128xf32>
    %60 = tpu.matmul %57, %59, %cst_76 {dimension_numbers = #tpu.dot_dimension_numbers<[1], [0], [0], [1], [0, 0, 1, 1], [], []>} : vector<8x256xbf16>, vector<256x128xbf16>, vector<8x128xf32> -> vector<8x128xf32>
    %61 = arith.addf %56, %60 : vector<8x128xf32>
    %c0_77 = arith.constant 0 : index
    %c0_78 = arith.constant 0 : index
    %62 = vector.load %arg8[%c0_77, %c0_78] : memref<1x128xf32, #tpu.memory_space<vmem>>, vector<1x128xf32>
    %63 = vector.broadcast %62 : vector<1x128xf32> to vector<8x128xf32>
    %64 = arith.addf %61, %63 : vector<8x128xf32>
    %cst_79 = arith.constant 0.000000e+00 : f32
    %65 = vector.broadcast %cst_79 : f32 to vector<8x128xf32>
    %66 = arith.maximumf %64, %65 : vector<8x128xf32>
    %67 = arith.truncf %66 : vector<8x128xf32> to vector<8x128xbf16>
    %c0_80 = arith.constant 0 : index
    %c0_81 = arith.constant 0 : index
    %68 = vector.load %arg9[%c0_80, %c0_81] : memref<128x1024xbf16, #tpu.memory_space<vmem>>, vector<128x1024xbf16>
    %cst_82 = arith.constant dense<0.000000e+00> : vector<8x1024xf32>
    %69 = tpu.matmul %67, %68, %cst_82 {dimension_numbers = #tpu.dot_dimension_numbers<[1], [0], [0], [1], [0, 0, 1, 1], [], []>} : vector<8x128xbf16>, vector<128x1024xbf16>, vector<8x1024xf32> -> vector<8x1024xf32>
    %c0_83 = arith.constant 0 : index
    %c0_84 = arith.constant 0 : index
    %70 = vector.load %arg10[%c0_83, %c0_84] : memref<1x1024xf32, #tpu.memory_space<vmem>>, vector<1x1024xf32>
    %71 = vector.broadcast %70 : vector<1x1024xf32> to vector<8x1024xf32>
    %72 = arith.addf %69, %71 : vector<8x1024xf32>
    %cst_85 = arith.constant 0.000000e+00 : f32
    %73 = vector.broadcast %cst_85 : f32 to vector<8x1024xf32>
    %74 = arith.maximumf %72, %73 : vector<8x1024xf32>
    %75 = arith.truncf %74 : vector<8x1024xf32> to vector<8x1024xbf16>
    %c0_86 = arith.constant 0 : index
    %c0_87 = arith.constant 0 : index
    %76 = vector.load %arg17[%c0_86, %c0_87] : memref<8x1024xbf16, #tpu.memory_space<vmem>>, vector<8x1024xbf16>
    tpu.vector_store %arg17[%c0_86, %c0_87], %75 {strides = array<i32>} : memref<8x1024xbf16, #tpu.memory_space<vmem>>, vector<8x1024xbf16>,
    %c0_88 = arith.constant 0 : index
    %c0_89 = arith.constant 0 : index
    %77 = vector.load %arg17[%c0_88, %c0_89] : memref<8x1024xbf16, #tpu.memory_space<vmem>>, vector<8x1024xbf16>
    %c0_90 = arith.constant 0 : index
    %c0_91 = arith.constant 0 : index
    %78 = vector.load %arg11[%c0_90, %c0_91] : memref<1024x128xbf16, #tpu.memory_space<vmem>>, vector<1024x128xbf16>
    %cst_92 = arith.constant dense<0.000000e+00> : vector<8x128xf32>
    %79 = tpu.matmul %77, %78, %cst_92 {dimension_numbers = #tpu.dot_dimension_numbers<[1], [0], [0], [1], [0, 0, 1, 1], [], []>} : vector<8x1024xbf16>, vector<1024x128xbf16>, vector<8x128xf32> -> vector<8x128xf32>
    %c0_93 = arith.constant 0 : index
    %c0_94 = arith.constant 0 : index
    %80 = vector.load %arg12[%c0_93, %c0_94] : memref<1x128xf32, #tpu.memory_space<vmem>>, vector<1x128xf32>
    %81 = vector.broadcast %80 : vector<1x128xf32> to vector<8x128xf32>
    %82 = arith.addf %79, %81 : vector<8x128xf32>
    %83 = vector.extract_strided_slice %82 {offsets = [0, 0], sizes = [8, 1], strides = [1, 1]} : vector<8x128xf32> to vector<8x1xf32>
    %84 = vector.extract_strided_slice %82 {offsets = [0, 1], sizes = [8, 8], strides = [1, 1]} : vector<8x128xf32> to vector<8x8xf32>
    %cst_95 = arith.constant dense<0.000000e+00> : vector<8xf32>
    %85 = vector.multi_reduction <add>, %84, %cst_95 [1] : vector<8x8xf32> to vector<8xf32>
    %86 = vector.shape_cast %85 : vector<8xf32> to vector<8x1xf32>
    %cst_96 = arith.constant 8.000000e+00 : f32
    %87 = vector.broadcast %cst_96 : f32 to vector<8x1xf32>
    %88 = arith.divf %86, %87 : vector<8x1xf32>
    %89 = vector.broadcast %88 : vector<8x1xf32> to vector<8x8xf32>
    %90 = arith.subf %84, %89 : vector<8x8xf32>
    %91 = vector.broadcast %83 : vector<8x1xf32> to vector<8x8xf32>
    %92 = arith.addf %91, %90 : vector<8x8xf32>
    %93 = arith.negf %92 : vector<8x8xf32>
    %94 = math.exp %93 : vector<8x8xf32>
    %cst_97 = arith.constant 1.000000e+00 : f32
    %95 = vector.broadcast %cst_97 : f32 to vector<8x8xf32>
    %96 = arith.addf %95, %94 : vector<8x8xf32>
    %97 = arith.divf %95, %96 : vector<8x8xf32>
    %c0_98 = arith.constant 0 : index
    %c0_99 = arith.constant 0 : index
    %98 = vector.load %arg13[%c0_98, %c0_99] : memref<8x8xf32, #tpu.memory_space<vmem>>, vector<8x8xf32>
    tpu.vector_store %arg13[%c0_98, %c0_99], %97 {strides = array<i32>} : memref<8x8xf32, #tpu.memory_space<vmem>>, vector<8x8xf32>,
    return
  }
  func.func @transform_0(%arg0: i32) -> (i32, i32) {
    %c0_i32 = arith.constant 0 : i32
    %c0_i32_0 = arith.constant 0 : i32
    return %arg0, %c0_i32 : i32, i32
  }
  func.func @transform_1(%arg0: i32) -> (i32, i32) {
    %c0_i32 = arith.constant 0 : i32
    %c0_i32_0 = arith.constant 0 : i32
    %c0_i32_1 = arith.constant 0 : i32
    return %c0_i32, %c0_i32_0 : i32, i32
  }
  func.func @transform_2(%arg0: i32) -> (i32, i32) {
    %c0_i32 = arith.constant 0 : i32
    %c0_i32_0 = arith.constant 0 : i32
    %c0_i32_1 = arith.constant 0 : i32
    return %c0_i32, %c0_i32_0 : i32, i32
  }
  func.func @transform_3(%arg0: i32) -> (i32, i32) {
    %c0_i32 = arith.constant 0 : i32
    %c0_i32_0 = arith.constant 0 : i32
    %c0_i32_1 = arith.constant 0 : i32
    return %c0_i32, %c0_i32_0 : i32, i32
  }
  func.func @transform_4(%arg0: i32) -> (i32, i32) {
    %c0_i32 = arith.constant 0 : i32
    %c0_i32_0 = arith.constant 0 : i32
    %c0_i32_1 = arith.constant 0 : i32
    return %c0_i32, %c0_i32_0 : i32, i32
  }
  func.func @transform_5(%arg0: i32) -> (i32, i32) {
    %c0_i32 = arith.constant 0 : i32
    %c0_i32_0 = arith.constant 0 : i32
    %c0_i32_1 = arith.constant 0 : i32
    return %c0_i32, %c0_i32_0 : i32, i32
  }
  func.func @transform_6(%arg0: i32) -> (i32, i32, i32) {
    %c0_i32 = arith.constant 0 : i32
    %c0_i32_0 = arith.constant 0 : i32
    %c0_i32_1 = arith.constant 0 : i32
    %c0_i32_2 = arith.constant 0 : i32
    return %c0_i32, %c0_i32_0, %c0_i32_1 : i32, i32, i32
  }
  func.func @transform_7(%arg0: i32) -> (i32, i32) {
    %c0_i32 = arith.constant 0 : i32
    %c0_i32_0 = arith.constant 0 : i32
    %c0_i32_1 = arith.constant 0 : i32
    return %c0_i32, %c0_i32_0 : i32, i32
  }
  func.func @transform_8(%arg0: i32) -> (i32, i32) {
    %c0_i32 = arith.constant 0 : i32
    %c0_i32_0 = arith.constant 0 : i32
    %c0_i32_1 = arith.constant 0 : i32
    return %c0_i32, %c0_i32_0 : i32, i32
  }
  func.func @transform_9(%arg0: i32) -> (i32, i32) {
    %c0_i32 = arith.constant 0 : i32
    %c0_i32_0 = arith.constant 0 : i32
    %c0_i32_1 = arith.constant 0 : i32
    return %c0_i32, %c0_i32_0 : i32, i32
  }
  func.func @transform_10(%arg0: i32) -> (i32, i32) {
    %c0_i32 = arith.constant 0 : i32
    %c0_i32_0 = arith.constant 0 : i32
    %c0_i32_1 = arith.constant 0 : i32
    return %c0_i32, %c0_i32_0 : i32, i32
  }
  func.func @transform_11(%arg0: i32) -> (i32, i32) {
    %c0_i32 = arith.constant 0 : i32
    %c0_i32_0 = arith.constant 0 : i32
    %c0_i32_1 = arith.constant 0 : i32
    return %c0_i32, %c0_i32_0 : i32, i32
  }
  func.func @transform_12(%arg0: i32) -> (i32, i32) {
    %c0_i32 = arith.constant 0 : i32
    %c0_i32_0 = arith.constant 0 : i32
    return %arg0, %c0_i32 : i32, i32
  }
}

</mosaic_0001>

<bundles_post_ra>
// kernel: termination_network_forward.1
= control target key start
LH: loop header
LB: loop body
LE: loop exit
PB: predicated region body
PF: predicated region fallthrough
CT: control target
= control target key end

     0   :  { %v6403_v22 = vmov 0   ;;  %vm4847_vm0 = vcmask 64512   ;;  %s8098_s2 = inlined_call_operand.vmem [shape: bf16[640,256], index: 2, kind: input, shape index: {}]   ;;  %s8099_s0 = inlined_call_operand.vmem [shape: bf16[72,640], index: 0, kind: input, shape index: {}]   ;;  %s8100_s1 = inlined_call_operand.vmem [shape: bf16[640,256], index: 1, kind: input, shape index: {}]   ;;  %s8101_s4 = inlined_call_operand.vmem [shape: bf16[1024,256], index: 4, kind: input, shape index: {}]   ;;  %s8102_s3 = inlined_call_operand.vmem [shape: f32[1,256], index: 3, kind: input, shape index: {}]   ;;  %s8103_s6 = inlined_call_operand.vmem [shape: bf16[3,256,128], index: 6, kind: input, shape index: {}]   ;;  %s8104_s5 = inlined_call_operand.vmem [shape: f32[1,256], index: 5, kind: input, shape index: {}]   ;;  %s8105_s8 = inlined_call_operand.vmem [shape: bf16[128,1024], index: 8, kind: input, shape index: {}]   ;;  %s8106_s10 = inlined_call_operand.vmem [shape: bf16[1024,128], index: 10, kind: input, shape index: {}]   ;;  %s8107_s7 = inlined_call_operand.vmem [shape: f32[1,128], index: 7, kind: input, shape index: {}]   ;;  %s8108_s9 = inlined_call_operand.vmem [shape: f32[1,1024], index: 9, kind: input, shape index: {}]   ;;  %s8109_s11 = inlined_call_operand.vmem [shape: f32[1,128], index: 11, kind: input, shape index: {}]   ;;  %s8110_s12 = inlined_call_operand.vmem [shape: f32[8,8], index: 12, kind: output, shape index: {}]  }
   0x1   :  { %v5799_v0 = vld [vmem:[%s8098_s2 + $0x4] ss:$8 sps:$4 sm:$0xff]   ;;  %v5801_v1 = vld [vmem:[%s8098_s2] ss:$8 sps:$4 sm:$0xff]   ;;  %v5802_v2 = vld [vmem:[%s8098_s2 + $0x14] ss:$8 sps:$4 sm:$0xff]   ;;  %5797 = vset.pattern.permute.xlu1 %v6403_v22  ;;  %5798 = vset.pattern.permute.xlu0 %v6403_v22 }
   0x2   :  { %754 = vmatprep.subr.bf16.mxu0 %v5799_v0  ;;  %v5804_v3 = vld [vmem:[%s8098_s2 + $0x10] ss:$8 sps:$4 sm:$0xff]   ;;  %v5805_v4 = vld [vmem:[%s8098_s2 + $0x24] ss:$8 sps:$4 sm:$0xff]   ;;  %v5807_v5 = vld [vmem:[%s8098_s2 + $0x20] ss:$8 sps:$4 sm:$0xff]  }
   0x3   :  { %755 = vmatpush1.bf16.msra.mxu0 %v5801_v1  ;;  %v5808_v6 = vld [vmem:[%s8098_s2 + $0x34] ss:$8 sps:$4 sm:$0xff]   ;;  %v5810_v7 = vld [vmem:[%s8098_s2 + $0x30] ss:$8 sps:$4 sm:$0xff]   ;;  %v5811_v8 = vld [vmem:[%s8098_s2 + $0x44] ss:$8 sps:$4 sm:$0xff]  }
   0x4   :  { %756 = vmatprep.subr.bf16.mxu0 %v5802_v2  ;;  %v5813_v9 = vld [vmem:[%s8098_s2 + $0x40] ss:$8 sps:$4 sm:$0xff]   ;;  %v5814_v10 = vld [vmem:[%s8098_s2 + $0x54] ss:$8 sps:$4 sm:$0xff]   ;;  %v5816_v11 = vld [vmem:[%s8098_s2 + $0x50] ss:$8 sps:$4 sm:$0xff]  }
   0x5   :  { %v5817_v12 = vld [vmem:[%s8098_s2 + $0x64] ss:$8 sps:$4 sm:$0xff]   ;;  %v6512_v13 = vld [vmem:[%s8099_s0 + $0x14] sm:$0xff]  ;;  %v5819_v16 = vld [vmem:[%s8098_s2 + $0x60] ss:$8 sps:$4 sm:$0xff]  }
   0x6   :  { %v6517_v14 = vld [vmem:[%s8099_s0 + $0x28] sm:$0xff]  ;;  %v5820_v17 = vld [vmem:[%s8098_s2 + $0x74] ss:$8 sps:$4 sm:$0xff]   ;;  %v5822_v18 = vld [vmem:[%s8098_s2 + $0x70] ss:$8 sps:$4 sm:$0xff]  }
   0x7   :  { %757 = vmatpush1.bf16.msra.mxu0 %v5804_v3  ;;  %v4875_v15 = vcombine.high %v6512_v13, %v6517_v14  ;;  %v5823_v19 = vld [vmem:[%s8098_s2 + $0x84] ss:$8 sps:$4 sm:$0xff]   ;;  %v5825_v20 = vld [vmem:[%s8098_s2 + $0x80] ss:$8 sps:$4 sm:$0xff]   ;;  %v5826_v21 = vld [vmem:[%s8098_s2 + $0x94] ss:$8 sps:$4 sm:$0xff]   ;;  %v4874_v39 = vcombine.low %v6512_v13, %v6517_v14 }
   0x8   :  { %758 = vmatprep.subr.bf16.mxu0 %v5805_v4  ;;  %v5828_v23 = vld [vmem:[%s8098_s2 + $0x90] ss:$8 sps:$4 sm:$0xff]   ;;  %v5829_v24 = vld [vmem:[%s8098_s2 + $0xa4] ss:$8 sps:$4 sm:$0xff]   ;;  %v5831_v25 = vld [vmem:[%s8098_s2 + $0xa0] ss:$8 sps:$4 sm:$0xff]  }
   0x9   :  { %786 = vmatprep.mubr.bf16.mxu0 %v4875_v15  ;;  %v5832_v26 = vld [vmem:[%s8098_s2 + $0xb4] ss:$8 sps:$4 sm:$0xff]   ;;  %v5834_v27 = vld [vmem:[%s8098_s2 + $0xb0] ss:$8 sps:$4 sm:$0xff]   ;;  %v5835_v28 = vld [vmem:[%s8098_s2 + $0xc4] ss:$8 sps:$4 sm:$0xff]  }
   0xa   :  { %v5837_v29 = vld [vmem:[%s8098_s2 + $0xc0] ss:$8 sps:$4 sm:$0xff]   ;;  %v5838_v30 = vld [vmem:[%s8098_s2 + $0xd4] ss:$8 sps:$4 sm:$0xff]   ;;  %v5840_v31 = vld [vmem:[%s8098_s2 + $0xd0] ss:$8 sps:$4 sm:$0xff]  }
   0xb   :  { %759 = vmatpush1.bf16.msra.mxu0 %v5807_v5  ;;  %v5841_v32 = vld [vmem:[%s8098_s2 + $0xe4] ss:$8 sps:$4 sm:$0xff]   ;;  %v5843_v33 = vld [vmem:[%s8098_s2 + $0xe0] ss:$8 sps:$4 sm:$0xff]   ;;  %v5844_v34 = vld [vmem:[%s8098_s2 + $0xf4] ss:$8 sps:$4 sm:$0xff]  }
   0xc   :  { %760 = vmatprep.subr.bf16.mxu0 %v5808_v6  ;;  %v5846_v35 = vld [vmem:[%s8098_s2 + $0xf0] ss:$8 sps:$4 sm:$0xff]   ;;  %v5851_v36 = vld [vmem:[%s8098_s2 + $0x104] ss:$8 sps:$4 sm:$0xff]   ;;  %v6586_v37 = vld [vmem:[%s8099_s0 + $0x3c] sm:$0xff] }
   0xd   :  { %v6591_v38 = vld [vmem:[%s8099_s0 + $0x50] sm:$0xff]  ;;  %v5849_v40 = vld [vmem:[%s8098_s2 + $0x100] ss:$8 sps:$4 sm:$0xff]   ;;  %v5857_v44 = vld [vmem:[%s8098_s2 + $0x124] ss:$8 sps:$4 sm:$0xff]  }
   0xe   :  { %v4880_v41 = vcombine.high %v6586_v37, %v6591_v38  ;;  %v5854_v42 = vld [vmem:[%s8098_s2 + $0x114] ss:$8 sps:$4 sm:$0xff]   ;;  %v5852_v43 = vld [vmem:[%s8098_s2 + $0x110] ss:$8 sps:$4 sm:$0xff]   ;;  %v6612_v45 = vld [vmem:[%s8099_s0 + $0x64] sm:$0xff]  ;;  %v4879_v47 = vcombine.low %v6586_v37, %v6591_v38 }
   0xf   :  { %761 = vmatpush1.bf16.msra.mxu0 %v5810_v7  ;;  %v6617_v46 = vld [vmem:[%s8099_s0 + $0x78] sm:$0xff]  ;;  %v5855_v48 = vld [vmem:[%s8098_s2 + $0x120] ss:$8 sps:$4 sm:$0xff]   ;;  %v5863_v52 = vld [vmem:[%s8098_s2 + $0x144] ss:$8 sps:$4 sm:$0xff]  }
  0x10   :  { %762 = vmatprep.subr.bf16.mxu0 %v5811_v8  ;;  %v4885_v49 = vcombine.high %v6612_v45, %v6617_v46  ;;  %v5860_v50 = vld [vmem:[%s8098_s2 + $0x134] ss:$8 sps:$4 sm:$0xff]   ;;  %v5858_v51 = vld [vmem:[%s8098_s2 + $0x130] ss:$8 sps:$4 sm:$0xff]   ;;  %v167_v54 = vld [vmem:[%s8099_s0 + $0xa0] sm:$0xff]  ;;  %v4884_v55 = vcombine.low %v6612_v45, %v6617_v46 }
  0x11   :  { %v6638_v53 = vld [vmem:[%s8099_s0 + $0x8c] sm:$0xff]  ;;  %v5861_v56 = vld [vmem:[%s8098_s2 + $0x140] ss:$8 sps:$4 sm:$0xff]   ;;  %v5866_v58 = vld [vmem:[%s8098_s2 + $0x154] ss:$8 sps:$4 sm:$0xff]  }
  0x12   :  { %v4890_v57 = vcombine.high %v6638_v53, %v167_v54  ;;  %v5864_v59 = vld [vmem:[%s8098_s2 + $0x150] ss:$8 sps:$4 sm:$0xff]   ;;  %v5869_v60 = vld [vmem:[%s8098_s2 + $0x164] ss:$8 sps:$4 sm:$0xff]   ;;  %v6661_v61 = vld [vmem:[%s8099_s0 + $0x1c] sm:$0xff]  ;;  %v4889_v63 = vcombine.low %v6638_v53, %v167_v54 }
  0x13   :  { %763 = vmatpush1.bf16.msra.mxu0 %v5813_v9  ;;  %v6666_v62 = vld [vmem:[%s8099_s0 + $0x30] sm:$0xff]  ;;  %v5867_v0 = vld [vmem:[%s8098_s2 + $0x160] ss:$8 sps:$4 sm:$0xff]   ;;  %v5875_v4 = vld [vmem:[%s8098_s2 + $0x184] ss:$8 sps:$4 sm:$0xff]  }
  0x14   :  { %764 = vmatprep.subr.bf16.mxu0 %v5814_v10  ;;  %v4877_v1 = vcombine.high %v6661_v61, %v6666_v62  ;;  %v5872_v2 = vld [vmem:[%s8098_s2 + $0x174] ss:$8 sps:$4 sm:$0xff]   ;;  %v5870_v3 = vld [vmem:[%s8098_s2 + $0x170] ss:$8 sps:$4 sm:$0xff]   ;;  %v5873_v5 = vld [vmem:[%s8098_s2 + $0x180] ss:$8 sps:$4 sm:$0xff]  }
  0x15   :  { %v5878_v6 = vld [vmem:[%s8098_s2 + $0x194] ss:$8 sps:$4 sm:$0xff]   ;;  %v5876_v7 = vld [vmem:[%s8098_s2 + $0x190] ss:$8 sps:$4 sm:$0xff]   ;;  %v5882_v8 = vld [vmem:[%s8098_s2 + $0x1a4] ss:$8 sps:$4 sm:$0xff]  }
  0x16   :  { %v5880_v9 = vld [vmem:[%s8098_s2 + $0x1a0] ss:$8 sps:$4 sm:$0xff]   ;;  %v5886_v10 = vld [vmem:[%s8098_s2 + $0x1b4] ss:$8 sps:$4 sm:$0xff]  }
  0x17   :  { %765 = vmatpush1.bf16.msra.mxu0 %v5816_v11  ;;  %v5884_v11 = vld [vmem:[%s8098_s2 + $0x1b0] ss:$8 sps:$4 sm:$0xff]   ;;  %v5888_v15 = vld [vmem:[%s8098_s2 + $0x1c0] ss:$8 sps:$4 sm:$0xff]  }
  0x18   :  { %766 = vmatprep.subr.bf16.mxu0 %v5817_v12  ;;  %v5890_v12 = vld [vmem:[%s8098_s2 + $0x1c4] ss:$8 sps:$4 sm:$0xff]   ;;  %v5928_v54 = vld [vmem:[%s8098_s2 + $0x260] ss:$8 sps:$4 sm:$0xff]  }
  0x1b   :  { %767 = vmatpush1.bf16.msra.mxu0 %v5819_v16  ;;  %v5894_v16 = vld [vmem:[%s8098_s2 + $0x1d4] ss:$8 sps:$4 sm:$0xff]  }
  0x1c   :  { %768 = vmatprep.subr.bf16.mxu0 %v5820_v17  ;;  %v5892_v17 = vld [vmem:[%s8098_s2 + $0x1d0] ss:$8 sps:$4 sm:$0xff]  }
  0x1f   :  { %769 = vmatpush1.bf16.msra.mxu0 %v5822_v18  ;;  %v5898_v18 = vld [vmem:[%s8098_s2 + $0x1e4] ss:$8 sps:$4 sm:$0xff]  }
  0x20   :  { %770 = vmatprep.subr.bf16.mxu0 %v5823_v19  ;;  %v5896_v19 = vld [vmem:[%s8098_s2 + $0x1e0] ss:$8 sps:$4 sm:$0xff]  }
  0x23   :  { %771 = vmatpush1.bf16.msra.mxu0 %v5825_v20  ;;  %v5902_v20 = vld [vmem:[%s8098_s2 + $0x1f4] ss:$8 sps:$4 sm:$0xff]  }
  0x24   :  { %772 = vmatprep.subr.bf16.mxu0 %v5826_v21  ;;  %v5900_v21 = vld [vmem:[%s8098_s2 + $0x1f0] ss:$8 sps:$4 sm:$0xff]  }
  0x27   :  { %773 = vmatpush1.bf16.msra.mxu0 %v5828_v23  ;;  %v5907_v23 = vld [vmem:[%s8098_s2 + $0x204] ss:$8 sps:$4 sm:$0xff]  }
  0x28   :  { %774 = vmatprep.subr.bf16.mxu0 %v5829_v24  ;;  %v6734_v24 = vld [vmem:[%s8099_s0 + $0x44] sm:$0xff] }
  0x2b   :  { %775 = vmatpush1.bf16.msra.mxu0 %v5831_v25  ;;  %v6739_v25 = vld [vmem:[%s8099_s0 + $0x58] sm:$0xff] }
  0x2c   :  { %776 = vmatprep.subr.bf16.mxu0 %v5832_v26  ;;  %v4876_v26 = vcombine.low %v6661_v61, %v6666_v62 }
  0x2f   :  { %777 = vmatpush1.bf16.msra.mxu0 %v5834_v27  ;;  %v5905_v27 = vld [vmem:[%s8098_s2 + $0x200] ss:$8 sps:$4 sm:$0xff]  }
  0x30   :  { %778 = vmatprep.subr.bf16.mxu0 %v5835_v28  ;;  %v4882_v28 = vcombine.high %v6734_v24, %v6739_v25 }
  0x33   :  { %779 = vmatpush1.bf16.msra.mxu0 %v5837_v29  ;;  %v5910_v29 = vld [vmem:[%s8098_s2 + $0x214] ss:$8 sps:$4 sm:$0xff]  }
  0x34   :  { %780 = vmatprep.subr.bf16.mxu0 %v5838_v30  ;;  %v5908_v30 = vld [vmem:[%s8098_s2 + $0x210] ss:$8 sps:$4 sm:$0xff]  }
  0x37   :  { %781 = vmatpush1.bf16.msra.mxu0 %v5840_v31  ;;  %v5914_v31 = vld [vmem:[%s8098_s2 + $0x224] ss:$8 sps:$4 sm:$0xff]  }
  0x38   :  { %782 = vmatprep.subr.bf16.mxu0 %v5841_v32  ;;  %v6760_v32 = vld [vmem:[%s8099_s0 + $0x6c] sm:$0xff] }
  0x3b   :  { %783 = vmatpush1.bf16.msra.mxu0 %v5843_v33  ;;  %v6765_v33 = vld [vmem:[%s8099_s0 + $0x80] sm:$0xff] }
  0x3c   :  { %784 = vmatprep.subr.bf16.mxu0 %v5844_v34  ;;  %v4881_v34 = vcombine.low %v6734_v24, %v6739_v25 }
  0x3f   :  { %785 = vmatpush1.bf16.msra.mxu0 %v5846_v35  ;;  %v5912_v35 = vld [vmem:[%s8098_s2 + $0x220] ss:$8 sps:$4 sm:$0xff]  }
  0x40   :  { %827 = vmatprep.subr.bf16.mxu0 %v5851_v36  ;;  %v4887_v36 = vcombine.high %v6760_v32, %v6765_v33 }
  0x42   :  { %787 = vmatmul.mubr.bf16.vlgmr.msra.gmra.mrb[0].mxu0 %v4874_v39  ;;  %v5918_v39 = vld [vmem:[%s8098_s2 + $0x234] ss:$8 sps:$4 sm:$0xff]  }
  0x43   :  { %828 = vmatpush1.bf16.msra.mxu0 %v5849_v40  ;;  %796 = vmatprep.mubr.bf16.mxu0 %v4880_v41  ;;  %v5916_v40 = vld [vmem:[%s8098_s2 + $0x230] ss:$8 sps:$4 sm:$0xff]   ;;  %v5922_v41 = vld [vmem:[%s8098_s2 + $0x244] ss:$8 sps:$4 sm:$0xff]  }
  0x44   :  { %829 = vmatprep.subr.bf16.mxu0 %v5854_v42  ;;  %v6786_v42 = vld [vmem:[%s8099_s0 + $0x94] sm:$0xff] }
  0x47   :  { %830 = vmatpush1.bf16.msra.mxu0 %v5852_v43  ;;  %v168_v43 = vld [vmem:[%s8099_s0 + $0xa8] sm:$0xff] }
  0x48   :  { %831 = vmatprep.subr.bf16.mxu0 %v5857_v44  ;;  %v4886_v44 = vcombine.low %v6760_v32, %v6765_v33 }
  0x4a   :  { %797 = vmatmul.mubr.bf16.gmra.mrb[4].mxu0 %v4879_v47  ;;  %v5920_v47 = vld [vmem:[%s8098_s2 + $0x240] ss:$8 sps:$4 sm:$0xff]  }
  0x4b   :  { %832 = vmatpush1.bf16.msra.mxu0 %v5855_v48  ;;  %806 = vmatprep.mubr.bf16.mxu0 %v4885_v49  ;;  %v4892_v48 = vcombine.high %v6786_v42, %v168_v43  ;;  %v5926_v49 = vld [vmem:[%s8098_s2 + $0x254] ss:$8 sps:$4 sm:$0xff]  }
  0x4c   :  { %833 = vmatprep.subr.bf16.mxu0 %v5860_v50  ;;  %v5924_v50 = vld [vmem:[%s8098_s2 + $0x250] ss:$8 sps:$4 sm:$0xff]  }
  0x4f   :  { %834 = vmatpush1.bf16.msra.mxu0 %v5858_v51  ;;  %v5930_v51 = vld [vmem:[%s8098_s2 + $0x264] ss:$8 sps:$4 sm:$0xff]  }
  0x50   :  { %835 = vmatprep.subr.bf16.mxu0 %v5863_v52  ;;  %v4891_v52 = vcombine.low %v6786_v42, %v168_v43  ;;  %v5991_v43 = vld [vmem:[%s8100_s1 + $0x104] ss:$8 sps:$4 sm:$0xff]  }
  0x52   :  { %807 = vmatmul.mubr.bf16.gmra.mrb[8].mxu0 %v4884_v55  ;;  %v5934_v55 = vld [vmem:[%s8098_s2 + $0x274] ss:$8 sps:$4 sm:$0xff]  }
  0x53   :  { %836 = vmatpush1.bf16.msra.mxu0 %v5861_v56  ;;  %816 = vmatprep.mubr.bf16.mxu0 %v4890_v57  ;;  %v5932_v56 = vld [vmem:[%s8098_s2 + $0x270] ss:$8 sps:$4 sm:$0xff]   ;;  %v5937_v57 = vld [vmem:[%s8100_s1 + $0x4] ss:$8 sps:$4 sm:$0xff]  }
  0x54   :  { %837 = vmatprep.subr.bf16.mxu0 %v5866_v58  ;;  %v5938_v58 = vld [vmem:[%s8099_s0 + $0x24] ss:$20 sps:$4 sm:$0xff]  }
  0x57   :  { %838 = vmatpush1.bf16.msra.mxu0 %v5864_v59  ;;  %v5935_v59 = vld [vmem:[%s8100_s1] ss:$8 sps:$4 sm:$0xff]  }
  0x58   :  { %839 = vmatprep.subr.bf16.mxu0 %v5869_v60  ;;  %v5941_v60 = vld [vmem:[%s8100_s1 + $0x14] ss:$8 sps:$4 sm:$0xff]  }
  0x5a   :  { %817 = vmatmul.mubr.bf16.gmra.mrb[12].mxu0 %v4889_v63  ;;  %v5939_v63 = vld [vmem:[%s8100_s1 + $0x10] ss:$8 sps:$4 sm:$0xff]  }
  0x5b   :  { %840 = vmatpush1.bf16.msra.mxu0 %v5867_v0  ;;  %859 = vmatprep.mubr.bf16.mxu0 %v4877_v1  ;;  %v5944_v0 = vld [vmem:[%s8100_s1 + $0x24] ss:$8 sps:$4 sm:$0xff]  }
  0x5c   :  { %841 = vmatprep.subr.bf16.mxu0 %v5872_v2  ;;  %v5969_v1 = vld [vmem:[%s8099_s0 + $0x4c] ss:$20 sps:$4 sm:$0xff]  }
  0x5d   :  { %v5942_v2 = vld [vmem:[%s8100_s1 + $0x20] ss:$8 sps:$4 sm:$0xff]  }
  0x5f   :  { %842 = vmatpush1.bf16.msra.mxu0 %v5870_v3  ;;  %v5947_v3 = vld [vmem:[%s8100_s1 + $0x34] ss:$8 sps:$4 sm:$0xff]  }
  0x60   :  { %843 = vmatprep.subr.bf16.mxu0 %v5875_v4  ;;  %v5945_v4 = vld [vmem:[%s8100_s1 + $0x30] ss:$8 sps:$4 sm:$0xff]  }
  0x63   :  { %844 = vmatpush1.bf16.msra.mxu0 %v5873_v5  ;;  %v5950_v5 = vld [vmem:[%s8100_s1 + $0x44] ss:$8 sps:$4 sm:$0xff]  }
  0x64   :  { %845 = vmatprep.subr.bf16.mxu0 %v5878_v6  ;;  %v5976_v6 = vld [vmem:[%s8099_s0 + $0x74] ss:$20 sps:$4 sm:$0xff]  }
  0x67   :  { %846 = vmatpush1.bf16.msra.mxu0 %v5876_v7  ;;  %v5948_v7 = vld [vmem:[%s8100_s1 + $0x40] ss:$8 sps:$4 sm:$0xff]  }
  0x68   :  { %847 = vmatprep.subr.bf16.mxu0 %v5882_v8  ;;  %v5953_v8 = vld [vmem:[%s8100_s1 + $0x54] ss:$8 sps:$4 sm:$0xff]  }
  0x6b   :  { %848 = vmatpush1.bf16.msra.mxu0 %v5880_v9  ;;  %v5951_v9 = vld [vmem:[%s8100_s1 + $0x50] ss:$8 sps:$4 sm:$0xff]  }
  0x6c   :  { %849 = vmatprep.subr.bf16.mxu0 %v5886_v10  ;;  %v5956_v10 = vld [vmem:[%s8100_s1 + $0x64] ss:$8 sps:$4 sm:$0xff]  }
  0x6f   :  { %850 = vmatpush1.bf16.msra.mxu0 %v5884_v11  ;;  %v42_v11 = vld [vmem:[%s8099_s0] sm:$0xff] }
  0x70   :  { %851 = vmatprep.subr.bf16.mxu0 %v5890_v12  ;;  %v5983_v12 = vld [vmem:[%s8099_s0 + $0x9c] ss:$20 sps:$4 sm:$0xff]  }
  0x73   :  { %852 = vmatpush1.bf16.msra.mxu0 %v5888_v15  ;;  %v5954_v15 = vld [vmem:[%s8100_s1 + $0x60] ss:$8 sps:$4 sm:$0xff]  }
  0x74   :  { %853 = vmatprep.subr.bf16.mxu0 %v5894_v16  ;;  %v4975_v16 = vcombine.high %v42_v11, %v6512_v13 }
  0x77   :  { %854 = vmatpush1.bf16.msra.mxu0 %v5892_v17  ;;  %v5959_v17 = vld [vmem:[%s8100_s1 + $0x74] ss:$8 sps:$4 sm:$0xff]  }
  0x78   :  { %855 = vmatprep.subr.bf16.mxu0 %v5898_v18  ;;  %v5957_v18 = vld [vmem:[%s8100_s1 + $0x70] ss:$8 sps:$4 sm:$0xff]  }
  0x7b   :  { %856 = vmatpush1.bf16.msra.mxu0 %v5896_v19  ;;  %v5962_v19 = vld [vmem:[%s8100_s1 + $0x84] ss:$8 sps:$4 sm:$0xff]  }
  0x7c   :  { %857 = vmatprep.subr.bf16.mxu0 %v5902_v20  ;;  %v5960_v20 = vld [vmem:[%s8100_s1 + $0x80] ss:$8 sps:$4 sm:$0xff]  }
  0x7f   :  { %858 = vmatpush1.bf16.msra.mxu0 %v5900_v21  ;;  %v5965_v21 = vld [vmem:[%s8100_s1 + $0x94] ss:$8 sps:$4 sm:$0xff]  }
  0x80   :  { %900 = vmatprep.subr.bf16.mxu0 %v5907_v23  ;;  %v5963_v23 = vld [vmem:[%s8100_s1 + $0x90] ss:$8 sps:$4 sm:$0xff]  }
  0x82   :  { %860 = vmatmul.mubr.bf16.vlgmr.msra.gmra.mrb[0].mxu0 %v4876_v26  ;;  %v5968_v26 = vld [vmem:[%s8100_s1 + $0xa4] ss:$8 sps:$4 sm:$0xff]  }
  0x83   :  { %901 = vmatpush1.bf16.msra.mxu0 %v5905_v27  ;;  %869 = vmatprep.mubr.bf16.mxu0 %v4882_v28  ;;  %v5966_v27 = vld [vmem:[%s8100_s1 + $0xa0] ss:$8 sps:$4 sm:$0xff]   ;;  %v5972_v28 = vld [vmem:[%s8100_s1 + $0xb4] ss:$8 sps:$4 sm:$0xff]  }
  0x84   :  { %902 = vmatprep.subr.bf16.mxu0 %v5910_v29  ;;  %v5970_v29 = vld [vmem:[%s8100_s1 + $0xb0] ss:$8 sps:$4 sm:$0xff]  }
  0x87   :  { %903 = vmatpush1.bf16.msra.mxu0 %v5908_v30  ;;  %v5975_v30 = vld [vmem:[%s8100_s1 + $0xc4] ss:$8 sps:$4 sm:$0xff]  }
  0x88   :  { %904 = vmatprep.subr.bf16.mxu0 %v5914_v31  ;;  %v5973_v31 = vld [vmem:[%s8100_s1 + $0xc0] ss:$8 sps:$4 sm:$0xff]  }
  0x8a   :  { %870 = vmatmul.mubr.bf16.gmra.mrb[4].mxu0 %v4881_v34  ;;  %v5979_v34 = vld [vmem:[%s8100_s1 + $0xd4] ss:$8 sps:$4 sm:$0xff]  }
  0x8b   :  { %905 = vmatpush1.bf16.msra.mxu0 %v5912_v35  ;;  %879 = vmatprep.mubr.bf16.mxu0 %v4887_v36  ;;  %v5977_v35 = vld [vmem:[%s8100_s1 + $0xd0] ss:$8 sps:$4 sm:$0xff]   ;;  %v5982_v36 = vld [vmem:[%s8100_s1 + $0xe4] ss:$8 sps:$4 sm:$0xff]  }
  0x8c   :  { %906 = vmatprep.subr.bf16.mxu0 %v5918_v39  ;;  %v5980_v39 = vld [vmem:[%s8100_s1 + $0xe0] ss:$8 sps:$4 sm:$0xff]  }
  0x8f   :  { %907 = vmatpush1.bf16.msra.mxu0 %v5916_v40  ;;  %v5986_v40 = vld [vmem:[%s8100_s1 + $0xf4] ss:$8 sps:$4 sm:$0xff]  }
  0x90   :  { %908 = vmatprep.subr.bf16.mxu0 %v5922_v41  ;;  %v5984_v41 = vld [vmem:[%s8100_s1 + $0xf0] ss:$8 sps:$4 sm:$0xff]  }
  0x92   :  { %880 = vmatmul.mubr.bf16.gmra.mrb[8].mxu0 %v4886_v44  ;;  %v6079_v44 = vld [vmem:[%s8101_s4 + $0x4] ss:$8 sps:$4 sm:$0xff]  }
  0x93   :  { %909 = vmatpush1.bf16.msra.mxu0 %v5920_v47  ;;  %889 = vmatprep.mubr.bf16.mxu0 %v4892_v48  ;;  %v6081_v47 = vld [vmem:[%s8101_s4] ss:$8 sps:$4 sm:$0xff]   ;;  %v6082_v48 = vld [vmem:[%s8101_s4 + $0x14] ss:$8 sps:$4 sm:$0xff]  }
  0x94   :  { %910 = vmatprep.subr.bf16.mxu0 %v5926_v49  ;;  %2724 = vmatprep.subr.bf16.mxu1 %v6079_v44  ;;  %v4974_v49 = vcombine.low %v42_v11, %v6512_v13  ;;  %v6085_v13 = vld [vmem:[%s8101_s4 + $0x24] ss:$8 sps:$4 sm:$0xff]   ;;  %v6099_v11 = vld [vmem:[%s8101_s4 + $0x60] ss:$8 sps:$4 sm:$0xff]   ;;  %v6042_v44 = vld [vmem:[%s8100_s1 + $0x1f4] ss:$8 sps:$4 sm:$0xff]  }
  0x95   :  { %2725 = vmatpush1.bf16.msra.mxu1 %v6081_v47  ;;  %v6040_v47 = vld [vmem:[%s8100_s1 + $0x1f0] ss:$8 sps:$4 sm:$0xff]  }
  0x96   :  { %2726 = vmatprep.subr.bf16.mxu1 %v6082_v48  ;;  %v6047_v48 = vld [vmem:[%s8100_s1 + $0x204] ss:$8 sps:$4 sm:$0xff]  }
  0x97   :  { %911 = vmatpush1.bf16.msra.mxu0 %v5924_v50  ;;  %v5989_v50 = vld [vmem:[%s8100_s1 + $0x100] ss:$8 sps:$4 sm:$0xff]  }
  0x98   :  { %912 = vmatprep.subr.bf16.mxu0 %v5930_v51  ;;  %v6084_v51 = vld [vmem:[%s8101_s4 + $0x10] ss:$8 sps:$4 sm:$0xff]  }
  0x99   :  { %2727 = vmatpush1.bf16.msra.mxu1 %v6084_v51  ;;  %v4982_v51 = vcombine.high %v6666_v62, %v6734_v24 }
  0x9a   :  { %890 = vmatmul.mubr.bf16.gmra.mrb[12].mxu0 %v4891_v52  ;;  %v5994_v52 = vld [vmem:[%s8100_s1 + $0x114] ss:$8 sps:$4 sm:$0xff]   ;;  %2728 = vmatprep.subr.bf16.mxu1 %v6085_v13  ;;  %v4981_v13 = vcombine.low %v6666_v62, %v6734_v24  ;;  %v6063_v62 = vld [vmem:[%s8100_s1 + $0x244] ss:$8 sps:$4 sm:$0xff]   ;;  %v4986_v24 = vcombine.low %v6739_v25, %v6760_v32 }
  0x9b   :  { %913 = vmatpush1.bf16.msra.mxu0 %v5928_v54  ;;  %932 = vmatprep.mubr.bf16.mxu0 %v6403_v22  ;;  %v4980_v54 = vcombine.high %v6517_v14, %v6586_v37 }
  0x9c   :  { %914 = vmatprep.subr.bf16.mxu0 %v5934_v55  ;;  %v5992_v55 = vld [vmem:[%s8100_s1 + $0x110] ss:$8 sps:$4 sm:$0xff]  }
  0x9f   :  { %915 = vmatpush1.bf16.msra.mxu0 %v5932_v56  ;;  %v6087_v56 = vld [vmem:[%s8101_s4 + $0x20] ss:$8 sps:$4 sm:$0xff]  }
  0xa0   :  { %1477 = vmatprep.subr.bf16.mxu0 %v5937_v57  ;;  %v6088_v57 = vld [vmem:[%s8101_s4 + $0x34] ss:$8 sps:$4 sm:$0xff]   ;;  %2729 = vmatpush1.bf16.msra.mxu1 %v6087_v56  ;;  %v4987_v56 = vcombine.high %v6739_v25, %v6760_v32  ;;  %v6071_v25 = vld [vmem:[%s8100_s1 + $0x264] ss:$8 sps:$4 sm:$0xff]   ;;  %v4991_v32 = vcombine.low %v6765_v33, %v6786_v42 }
  0xa1   :  { %2730 = vmatprep.subr.bf16.mxu1 %v6088_v57  ;;  %v6058_v57 = vld [vmem:[%s8100_s1 + $0x234] ss:$8 sps:$4 sm:$0xff]  }
  0xa2   :  { %933 = vmatmul.mubr.bf16.vlgmr.msra.gmra.mrb[0].mxu0 %v5938_v58  ;;  %v5997_v58 = vld [vmem:[%s8100_s1 + $0x124] ss:$8 sps:$4 sm:$0xff]  }
  0xa3   :  { %1478 = vmatpush1.bf16.msra.mxu0 %v5935_v59  ;;  %942 = vmatprep.mubr.bf16.mxu0 %v6403_v22  ;;  %v5995_v59 = vld [vmem:[%s8100_s1 + $0x120] ss:$8 sps:$4 sm:$0xff]  }
  0xa4   :  { %1479 = vmatprep.subr.bf16.mxu0 %v5941_v60  ;;  %v6000_v60 = vld [vmem:[%s8100_s1 + $0x134] ss:$8 sps:$4 sm:$0xff]  }
  0xa7   :  { %1480 = vmatpush1.bf16.msra.mxu0 %v5939_v63  ;;  %v4979_v63 = vcombine.low %v6517_v14, %v6586_v37  ;;  %v5998_v14 = vld [vmem:[%s8100_s1 + $0x130] ss:$8 sps:$4 sm:$0xff]   ;;  %v6094_v37 = vld [vmem:[%s8101_s4 + $0x54] ss:$8 sps:$4 sm:$0xff]  }
  0xa8   :  { %1481 = vmatprep.subr.bf16.mxu0 %v5944_v0  ;;  %v6090_v0 = vld [vmem:[%s8101_s4 + $0x30] ss:$8 sps:$4 sm:$0xff]  }
  0xa9   :  { %2731 = vmatpush1.bf16.msra.mxu1 %v6090_v0  ;;  %v6064_v0 = vld [vmem:[%s8100_s1 + $0x250] ss:$8 sps:$4 sm:$0xff]  }
  0xaa   :  { %943 = vmatmul.mubr.bf16.gmra.mrb[4].mxu0 %v5969_v1  ;;  %v6091_v1 = vld [vmem:[%s8101_s4 + $0x44] ss:$8 sps:$4 sm:$0xff]  }
  0xab   :  { %1482 = vmatpush1.bf16.msra.mxu0 %v5942_v2  ;;  %952 = vmatprep.mubr.bf16.mxu0 %v6403_v22  ;;  %v4985_v2 = vcombine.high %v6591_v38, %v6612_v45 }
  0xac   :  { %1483 = vmatprep.subr.bf16.mxu0 %v5947_v3  ;;  %v6093_v3 = vld [vmem:[%s8101_s4 + $0x40] ss:$8 sps:$4 sm:$0xff]   ;;  %2732 = vmatprep.subr.bf16.mxu1 %v6091_v1 }
  0xad   :  { %2733 = vmatpush1.bf16.msra.mxu1 %v6093_v3  ;;  %v6069_v1 = vld [vmem:[%s8100_s1 + $0x260] ss:$8 sps:$4 sm:$0xff]   ;;  %v6072_v3 = vld [vmem:[%s8100_s1 + $0x270] ss:$8 sps:$4 sm:$0xff]  }
  0xae   :  { %2734 = vmatprep.subr.bf16.mxu1 %v6094_v37  ;;  %v6078_v37 = vld [vmem:[%s8099_s0 + $0x88] ss:$20 sps:$4 sm:$0xff]  }
  0xaf   :  { %1484 = vmatpush1.bf16.msra.mxu0 %v5945_v4  ;;  %v6003_v4 = vld [vmem:[%s8100_s1 + $0x144] ss:$8 sps:$4 sm:$0xff]  }
  0xb0   :  { %1485 = vmatprep.subr.bf16.mxu0 %v5950_v5  ;;  %v6096_v5 = vld [vmem:[%s8101_s4 + $0x50] ss:$8 sps:$4 sm:$0xff]  }
  0xb1   :  { %2735 = vmatpush1.bf16.msra.mxu1 %v6096_v5  ;;  %v6108_v5 = vld [vmem:[%s8101_s4 + $0x90] ss:$8 sps:$4 sm:$0xff]  }
  0xb2   :  { %953 = vmatmul.mubr.bf16.gmra.mrb[8].mxu0 %v5976_v6  ;;  %v6001_v6 = vld [vmem:[%s8100_s1 + $0x140] ss:$8 sps:$4 sm:$0xff]  }
  0xb3   :  { %1486 = vmatpush1.bf16.msra.mxu0 %v5948_v7  ;;  %962 = vmatprep.mubr.bf16.mxu0 %v6403_v22  ;;  %v6006_v7 = vld [vmem:[%s8100_s1 + $0x154] ss:$8 sps:$4 sm:$0xff]  }
  0xb4   :  { %1487 = vmatprep.subr.bf16.mxu0 %v5953_v8  ;;  %v4984_v8 = vcombine.low %v6591_v38, %v6612_v45  ;;  %v6100_v38 = vld [vmem:[%s8101_s4 + $0x74] ss:$8 sps:$4 sm:$0xff]   ;;  %v6009_v45 = vld [vmem:[%s8100_s1 + $0x164] ss:$8 sps:$4 sm:$0xff]  }
  0xb7   :  { %1488 = vmatpush1.bf16.msra.mxu0 %v5951_v9  ;;  %v6097_v9 = vld [vmem:[%s8101_s4 + $0x64] ss:$8 sps:$4 sm:$0xff]  }
  0xb8   :  { %1489 = vmatprep.subr.bf16.mxu0 %v5956_v10  ;;  %v4990_v10 = vcombine.high %v6617_v46, %v6638_v53  ;;  %2736 = vmatprep.subr.bf16.mxu1 %v6097_v9  ;;  %v6114_v9 = vld [vmem:[%s8101_s4 + $0xb0] ss:$8 sps:$4 sm:$0xff]  }
  0xb9   :  { %2737 = vmatpush1.bf16.msra.mxu1 %v6099_v11  ;;  %v6117_v11 = vld [vmem:[%s8101_s4 + $0xc0] ss:$8 sps:$4 sm:$0xff]  }
  0xba   :  { %963 = vmatmul.mubr.bf16.gmra.mrb[12].mxu0 %v5983_v12  ;;  %v6004_v12 = vld [vmem:[%s8100_s1 + $0x150] ss:$8 sps:$4 sm:$0xff]   ;;  %2738 = vmatprep.subr.bf16.mxu1 %v6100_v38 }
  0xbb   :  { %1490 = vmatpush1.bf16.msra.mxu0 %v5954_v15  ;;  %1509 = vmatprep.mubr.bf16.mxu0 %v4975_v16  ;;  %v7030_v15 = vld [vmem:[%s8099_s0 + $0x8] sm:$0xff]  ;;  %v6102_v16 = vld [vmem:[%s8101_s4 + $0x70] ss:$8 sps:$4 sm:$0xff]  }
  0xbc   :  { %1491 = vmatprep.subr.bf16.mxu0 %v5959_v17  ;;  %v6007_v17 = vld [vmem:[%s8100_s1 + $0x160] ss:$8 sps:$4 sm:$0xff]   ;;  %v6120_v38 = vld [vmem:[%s8101_s4 + $0xd0] ss:$8 sps:$4 sm:$0xff]  }
  0xbd   :  { %2739 = vmatpush1.bf16.msra.mxu1 %v6102_v16  ;;  %v6124_v16 = vld [vmem:[%s8101_s4 + $0xf4] ss:$8 sps:$4 sm:$0xff]  }
  0xbf   :  { %1492 = vmatpush1.bf16.msra.mxu0 %v5957_v18  ;;  %v6012_v18 = vld [vmem:[%s8100_s1 + $0x174] ss:$8 sps:$4 sm:$0xff]  }
  0xc0   :  { %1493 = vmatprep.subr.bf16.mxu0 %v5962_v19  ;;  %v4989_v19 = vcombine.low %v6617_v46, %v6638_v53  ;;  %v6015_v46 = vld [vmem:[%s8100_s1 + $0x184] ss:$8 sps:$4 sm:$0xff]   ;;  %v6013_v53 = vld [vmem:[%s8100_s1 + $0x180] ss:$8 sps:$4 sm:$0xff]  }
  0xc3   :  { %1494 = vmatpush1.bf16.msra.mxu0 %v5960_v20  ;;  %v6103_v20 = vld [vmem:[%s8101_s4 + $0x84] ss:$8 sps:$4 sm:$0xff]  }
  0xc4   :  { %1495 = vmatprep.subr.bf16.mxu0 %v5965_v21  ;;  %v4977_v21 = vcombine.high %v7030_v15, %v6661_v61  ;;  %2740 = vmatprep.subr.bf16.mxu1 %v6103_v20 }
  0xc7   :  { %1496 = vmatpush1.bf16.msra.mxu0 %v5963_v23  ;;  %v6105_v23 = vld [vmem:[%s8101_s4 + $0x80] ss:$8 sps:$4 sm:$0xff]  }
  0xc8   :  { %1497 = vmatprep.subr.bf16.mxu0 %v5968_v26  ;;  %v6010_v26 = vld [vmem:[%s8100_s1 + $0x170] ss:$8 sps:$4 sm:$0xff]   ;;  %2741 = vmatpush1.bf16.msra.mxu1 %v6105_v23  ;;  %v1696_v23 = vld [vmem:[%s8102_s3] sm:$0x3] }
  0xcb   :  { %1498 = vmatpush1.bf16.msra.mxu0 %v5966_v27  ;;  %v6018_v27 = vld [vmem:[%s8100_s1 + $0x194] ss:$8 sps:$4 sm:$0xff]  }
  0xcc   :  { %1499 = vmatprep.subr.bf16.mxu0 %v5972_v28  ;;  %v6016_v28 = vld [vmem:[%s8100_s1 + $0x190] ss:$8 sps:$4 sm:$0xff]  }
  0xcf   :  { %1500 = vmatpush1.bf16.msra.mxu0 %v5970_v29  ;;  %v6023_v29 = vld [vmem:[%s8100_s1 + $0x1a4] ss:$8 sps:$4 sm:$0xff]  }
  0xd0   :  { %1501 = vmatprep.subr.bf16.mxu0 %v5975_v30  ;;  %v6021_v30 = vld [vmem:[%s8100_s1 + $0x1a0] ss:$8 sps:$4 sm:$0xff]  }
  0xd3   :  { %1502 = vmatpush1.bf16.msra.mxu0 %v5973_v31  ;;  %v6026_v31 = vld [vmem:[%s8100_s1 + $0x1b4] ss:$8 sps:$4 sm:$0xff]  }
  0xd4   :  { %1503 = vmatprep.subr.bf16.mxu0 %v5979_v34  ;;  %v6024_v34 = vld [vmem:[%s8100_s1 + $0x1b0] ss:$8 sps:$4 sm:$0xff]  }
  0xd7   :  { %1504 = vmatpush1.bf16.msra.mxu0 %v5977_v35  ;;  %v6031_v35 = vld [vmem:[%s8100_s1 + $0x1c4] ss:$8 sps:$4 sm:$0xff]  }
  0xd8   :  { %1505 = vmatprep.subr.bf16.mxu0 %v5982_v36  ;;  %v6029_v36 = vld [vmem:[%s8100_s1 + $0x1c0] ss:$8 sps:$4 sm:$0xff]  }
  0xdb   :  { %1506 = vmatpush1.bf16.msra.mxu0 %v5980_v39  ;;  %v6034_v39 = vld [vmem:[%s8100_s1 + $0x1d4] ss:$8 sps:$4 sm:$0xff]  }
  0xdc   :  { %1507 = vmatprep.subr.bf16.mxu0 %v5986_v40  ;;  %v6032_v40 = vld [vmem:[%s8100_s1 + $0x1d0] ss:$8 sps:$4 sm:$0xff]  }
  0xdf   :  { %1508 = vmatpush1.bf16.msra.mxu0 %v5984_v41  ;;  %v6039_v41 = vld [vmem:[%s8100_s1 + $0x1e4] ss:$8 sps:$4 sm:$0xff]  }
  0xe0   :  { %1550 = vmatprep.subr.bf16.mxu0 %v5991_v43  ;;  %v6037_v43 = vld [vmem:[%s8100_s1 + $0x1e0] ss:$8 sps:$4 sm:$0xff]  }
  0xe2   :  { %1510 = vmatmul.mubr.bf16.vlgmr.msra.gmra.mrb[0].mxu0 %v4974_v49  ;;  %v4976_v49 = vcombine.low %v7030_v15, %v6661_v61  ;;  %v6055_v61 = vld [vmem:[%s8100_s1 + $0x224] ss:$8 sps:$4 sm:$0xff]   ;;  %v6123_v15 = vld [vmem:[%s8101_s4 + $0xe0] ss:$8 sps:$4 sm:$0xff]  }
  0xe3   :  { %1551 = vmatpush1.bf16.msra.mxu0 %v5989_v50  ;;  %1519 = vmatprep.mubr.bf16.mxu0 %v4980_v54  ;;  %v6045_v50 = vld [vmem:[%s8100_s1 + $0x200] ss:$8 sps:$4 sm:$0xff]   ;;  %v6048_v54 = vld [vmem:[%s8100_s1 + $0x210] ss:$8 sps:$4 sm:$0xff]  }
  0xe4   :  { %1552 = vmatprep.subr.bf16.mxu0 %v5994_v52  ;;  %v6050_v52 = vld [vmem:[%s8100_s1 + $0x214] ss:$8 sps:$4 sm:$0xff]  }
  0xe7   :  { %1553 = vmatpush1.bf16.msra.mxu0 %v5992_v55  ;;  %v6053_v55 = vld [vmem:[%s8100_s1 + $0x220] ss:$8 sps:$4 sm:$0xff]  }
  0xe8   :  { %1554 = vmatprep.subr.bf16.mxu0 %v5997_v58  ;;  %v6056_v58 = vld [vmem:[%s8100_s1 + $0x230] ss:$8 sps:$4 sm:$0xff]  }
  0xea   :  { %1520 = vmatmul.mubr.bf16.gmra.mrb[4].mxu0 %v4979_v63  ;;  %v6066_v63 = vld [vmem:[%s8100_s1 + $0x254] ss:$8 sps:$4 sm:$0xff]  }
  0xeb   :  { %1555 = vmatpush1.bf16.msra.mxu0 %v5995_v59  ;;  %1529 = vmatprep.mubr.bf16.mxu0 %v4985_v2  ;;  %v6061_v59 = vld [vmem:[%s8100_s1 + $0x240] ss:$8 sps:$4 sm:$0xff]   ;;  %v6074_v2 = vld [vmem:[%s8100_s1 + $0x274] ss:$8 sps:$4 sm:$0xff]  }
  0xec   :  { %1556 = vmatprep.subr.bf16.mxu0 %v6000_v60  ;;  %v4992_v60 = vcombine.high %v6765_v33, %v6786_v42  ;;  %v6075_v33 = vld [vmem:[%s8099_s0 + $0x10] ss:$20 sps:$4 sm:$0xff]   ;;  %v6076_v42 = vld [vmem:[%s8099_s0 + $0x38] ss:$20 sps:$4 sm:$0xff]  }
  0xef   :  { %1557 = vmatpush1.bf16.msra.mxu0 %v5998_v14  ;;  %v6077_v14 = vld [vmem:[%s8099_s0 + $0x60] ss:$20 sps:$4 sm:$0xff]  }
  0xf0   :  { %1558 = vmatprep.subr.bf16.mxu0 %v6003_v4  ;;  %v6106_v4 = vld [vmem:[%s8101_s4 + $0x94] ss:$8 sps:$4 sm:$0xff]  }
  0xf1   :  { %2742 = vmatprep.subr.bf16.mxu1 %v6106_v4  ;;  %v6128_v4 = vld [vmem:[%s8101_s4 + $0x100] ss:$8 sps:$4 sm:$0xff]  }
  0xf2   :  { %1530 = vmatmul.mubr.bf16.gmra.mrb[8].mxu0 %v4984_v8  ;;  %2743 = vmatpush1.bf16.msra.mxu1 %v6108_v5  ;;  %v6112_v8 = vld [vmem:[%s8101_s4 + $0xb4] ss:$8 sps:$4 sm:$0xff]  }
  0xf3   :  { %1559 = vmatpush1.bf16.msra.mxu0 %v6001_v6  ;;  %1539 = vmatprep.mubr.bf16.mxu0 %v4990_v10  ;;  %v6109_v6 = vld [vmem:[%s8101_s4 + $0xa4] ss:$8 sps:$4 sm:$0xff]  }
  0xf4   :  { %1560 = vmatprep.subr.bf16.mxu0 %v6006_v7  ;;  %v6111_v7 = vld [vmem:[%s8101_s4 + $0xa0] ss:$8 sps:$4 sm:$0xff]   ;;  %2744 = vmatprep.subr.bf16.mxu1 %v6109_v6  ;;  %v6115_v10 = vld [vmem:[%s8101_s4 + $0xc4] ss:$8 sps:$4 sm:$0xff]  }
  0xf6   :  { %2745 = vmatpush1.bf16.msra.mxu1 %v6111_v7  ;;  %v6134_v7 = vld [vmem:[%s8101_s4 + $0x114] ss:$8 sps:$4 sm:$0xff]  }
  0xf7   :  { %1561 = vmatpush1.bf16.msra.mxu0 %v6004_v12  ;;  %2746 = vmatprep.subr.bf16.mxu1 %v6112_v8  ;;  %v6118_v12 = vld [vmem:[%s8101_s4 + $0xd4] ss:$8 sps:$4 sm:$0xff]  }
  0xf8   :  { %1562 = vmatprep.subr.bf16.mxu0 %v6009_v45  ;;  %v6121_v45 = vld [vmem:[%s8101_s4 + $0xe4] ss:$8 sps:$4 sm:$0xff]  }
  0xfa   :  { %1540 = vmatmul.mubr.bf16.gmra.mrb[12].mxu0 %v4989_v19  ;;  %2747 = vmatpush1.bf16.msra.mxu1 %v6114_v9  ;;  %v1698_v19 = vlaneseq }
  0xfb   :  { %1563 = vmatpush1.bf16.msra.mxu0 %v6007_v17  ;;  %1582 = vmatprep.mubr.bf16.mxu0 %v4977_v21  ;;  %v6126_v17 = vld [vmem:[%s8101_s4 + $0xf0] ss:$8 sps:$4 sm:$0xff]  }
  0xfc   :  { %1564 = vmatprep.subr.bf16.mxu0 %v6012_v18  ;;  %2748 = vmatprep.subr.bf16.mxu1 %v6115_v10  ;;  %v6130_v18 = vld [vmem:[%s8101_s4 + $0x104] ss:$8 sps:$4 sm:$0xff]   ;;  %v7225_v20 = vshrl.u32 %v1698_v19, 7  ;;  %v6132_v19 = vld [vmem:[%s8101_s4 + $0x110] ss:$8 sps:$4 sm:$0xff]  }
  0xfe   :  { %2749 = vmatpush1.bf16.msra.mxu1 %v6117_v11  ;;  %v7228_v21 = vsub.s32 0, %v7225_v20 }
  0xff   :  { %1565 = vmatpush1.bf16.msra.mxu0 %v6010_v26  ;;  %2750 = vmatprep.subr.bf16.mxu1 %v6118_v12  ;;  %v7234_v26 = vsub.s32 1, %v7225_v20 }
 0x100   :  { %1566 = vmatprep.subr.bf16.mxu0 %v6015_v46  ;;  %v1701_v46 = vrot.slane %v1696_v23, %v7228_v21 }
 0x102   :  { %2751 = vmatpush1.bf16.msra.mxu1 %v6120_v38 }
 0x103   :  { %1567 = vmatpush1.bf16.msra.mxu0 %v6013_v53  ;;  %2752 = vmatprep.subr.bf16.mxu1 %v6121_v45  ;;  %v1705_v53 = vrot.slane %v1696_v23, %v7234_v26 }
 0x104   :  { %1568 = vmatprep.subr.bf16.mxu0 %v6018_v27 }
 0x106   :  { %2753 = vmatpush1.bf16.msra.mxu1 %v6123_v15 }
 0x107   :  { %1569 = vmatpush1.bf16.msra.mxu0 %v6016_v28  ;;  %2754 = vmatprep.subr.bf16.mxu1 %v6124_v16 }
 0x108   :  { %1570 = vmatprep.subr.bf16.mxu0 %v6023_v29 }
 0x10a   :  { %2755 = vmatpush1.bf16.msra.mxu1 %v6126_v17 }
 0x10b   :  { %1571 = vmatpush1.bf16.msra.mxu0 %v6021_v30  ;;  %2775 = vmatprep.subr.bf16.mxu1 %v6130_v18 }
 0x10c   :  { %1572 = vmatprep.subr.bf16.mxu0 %v6026_v31 }
 0x10f   :  { %1573 = vmatpush1.bf16.msra.mxu0 %v6024_v34 }
 0x110   :  { %1574 = vmatprep.subr.bf16.mxu0 %v6031_v35 }
 0x113   :  { %1575 = vmatpush1.bf16.msra.mxu0 %v6029_v36 }
 0x114   :  { %1576 = vmatprep.subr.bf16.mxu0 %v6034_v39 }
 0x117   :  { %1577 = vmatpush1.bf16.msra.mxu0 %v6032_v40 }
 0x118   :  { %1578 = vmatprep.subr.bf16.mxu0 %v6039_v41 }
 0x11b   :  { %1579 = vmatpush1.bf16.msra.mxu0 %v6037_v43 }
 0x11c   :  { %1580 = vmatprep.subr.bf16.mxu0 %v6042_v44 }
 0x11f   :  { %1581 = vmatpush1.bf16.msra.mxu0 %v6040_v47 }
 0x120   :  { %1623 = vmatprep.subr.bf16.mxu0 %v6047_v48 }
 0x122   :  { %1583 = vmatmul.mubr.bf16.vlgmr.msra.gmra.mrb[0].mxu0 %v4976_v49 }
 0x123   :  { %1624 = vmatpush1.bf16.msra.mxu0 %v6045_v50  ;;  %1592 = vmatprep.mubr.bf16.mxu0 %v4982_v51 }
 0x124   :  { %1625 = vmatprep.subr.bf16.mxu0 %v6050_v52 }
 0x127   :  { %1626 = vmatpush1.bf16.msra.mxu0 %v6048_v54 }
 0x128   :  { %1627 = vmatprep.subr.bf16.mxu0 %v6055_v61 }
 0x12a   :  { %1593 = vmatmul.mubr.bf16.gmra.mrb[4].mxu0 %v4981_v13 }
 0x12b   :  { %1628 = vmatpush1.bf16.msra.mxu0 %v6053_v55  ;;  %1602 = vmatprep.mubr.bf16.mxu0 %v4987_v56 }
 0x12c   :  { %1629 = vmatprep.subr.bf16.mxu0 %v6058_v57 }
 0x12f   :  { %1630 = vmatpush1.bf16.msra.mxu0 %v6056_v58 }
 0x130   :  { %1631 = vmatprep.subr.bf16.mxu0 %v6063_v62 }
 0x132   :  { %1603 = vmatmul.mubr.bf16.gmra.mrb[8].mxu0 %v4986_v24 }
 0x133   :  { %1632 = vmatpush1.bf16.msra.mxu0 %v6061_v59  ;;  %1612 = vmatprep.mubr.bf16.mxu0 %v4992_v60 }
 0x134   :  { %1633 = vmatprep.subr.bf16.mxu0 %v6066_v63 }
 0x137   :  { %1634 = vmatpush1.bf16.msra.mxu0 %v6064_v0 }
 0x138   :  { %1635 = vmatprep.subr.bf16.mxu0 %v6071_v25 }
 0x13a   :  { %1613 = vmatmul.mubr.bf16.gmra.mrb[12].mxu0 %v4991_v32 }
 0x13b   :  { %1636 = vmatpush1.bf16.msra.mxu0 %v6069_v1  ;;  %1655 = vmatprep.mubr.bf16.mxu0 %v6403_v22 }
 0x13c   :  { %1637 = vmatprep.subr.bf16.mxu0 %v6074_v2 }
 0x13f   :  { %1638 = vmatpush1.bf16.msra.mxu0 %v6072_v3 }
 0x142   :  { %1656 = vmatmul.mubr.bf16.vlgmr.msra.gmra.mrb[0].mxu0 %v6075_v33 }
 0x143   :  { %1665 = vmatprep.mubr.bf16.mxu0 %v6403_v22 }
 0x14a   :  { %1666 = vmatmul.mubr.bf16.gmra.mrb[4].mxu0 %v6076_v42 }
 0x14b   :  { %1675 = vmatprep.mubr.bf16.mxu0 %v6403_v22 }
 0x152   :  { %1676 = vmatmul.mubr.bf16.gmra.mrb[8].mxu0 %v6077_v14 }
 0x153   :  { %1685 = vmatprep.mubr.bf16.mxu0 %v6403_v22 }
 0x15a   :  { %1686 = vmatmul.mubr.bf16.gmra.mrb[12].mxu0 %v6078_v37 }
 0x215   :  { %v1657_v27 = vpop.f32.mrb[0].mxu0 }
 0x216   :  { %v1708_v28 = vadd.f32 %v1701_v46, %v1657_v27  ;;  %v1659_v29 = vpop.f32.mrb[1].mxu0 }
 0x217   :  { %v1709_v30 = vadd.f32 %v1705_v53, %v1659_v29  ;;  %v1661_v31 = vpop.f32.mrb[2].mxu0 }
 0x218   :  { %v1710_v34 = vadd.f32 %v1701_v46, %v1661_v31  ;;  %v1663_v35 = vpop.f32.mrb[3].mxu0  ;;  %v1724_v39 = vmax.f32 %v1708_v28, 0.0  ;;  %v6138_v28 = vld [vmem:[%s8101_s4 + $0x124] ss:$8 sps:$4 sm:$0xff]  }
 0x219   :  { %v1711_v36 = vadd.f32 %v1705_v53, %v1663_v35  ;;  %v1725_v41 = vmax.f32 %v1709_v30, 0.0 }
 0x21a   :  { %v1726_v40 = vmax.f32 %v1710_v34, 0.0  ;;  %v6143_v34 = vld [vmem:[%s8101_s4 + $0x134] ss:$8 sps:$4 sm:$0xff]  }
 0x21b   :  { %v1727_v43 = vmax.f32 %v1711_v36, 0.0  ;;  %v6141_v36 = vld [vmem:[%s8101_s4 + $0x130] ss:$8 sps:$4 sm:$0xff]  }
 0x21c   :  { %v1740_v44 = vpack.c.bf16 %v1726_v40, %v1724_v39  ;;  %v6146_v39 = vld [vmem:[%s8101_s4 + $0x144] ss:$8 sps:$4 sm:$0xff]   ;;  %v6144_v40 = vld [vmem:[%s8101_s4 + $0x140] ss:$8 sps:$4 sm:$0xff]  }
 0x21d   :  { %v1741_v47 = vpack.c.bf16 %v1727_v43, %v1725_v41  ;;  %v1667_v48 = vpop.f32.mrb[4].mxu0  ;;  %v6149_v41 = vld [vmem:[%s8101_s4 + $0x154] ss:$8 sps:$4 sm:$0xff]   ;;  %v6147_v43 = vld [vmem:[%s8101_s4 + $0x150] ss:$8 sps:$4 sm:$0xff]  }
 0x21e   :  { %1748 = vst [vmem:[#allocation2] sm:$0xff] %v1740_v44  ;;  %v1712_v49 = vadd.f32 %v1701_v46, %v1667_v48  ;;  %v1669_v50 = vpop.f32.mrb[5].mxu0  ;;  %v6152_v44 = vld [vmem:[%s8101_s4 + $0x164] ss:$8 sps:$4 sm:$0xff]   ;;  %v6155_v48 = vld [vmem:[%s8101_s4 + $0x174] ss:$8 sps:$4 sm:$0xff]  }
 0x21f   :  { %1749 = vst [vmem:[#allocation2 + $0x8] sm:$0xff] %v1741_v47  ;;  %v1713_v51 = vadd.f32 %v1705_v53, %v1669_v50  ;;  %v1671_v52 = vpop.f32.mrb[6].mxu0  ;;  %v6150_v47 = vld [vmem:[%s8101_s4 + $0x160] ss:$8 sps:$4 sm:$0xff]   ;;  %v6158_v50 = vld [vmem:[%s8101_s4 + $0x184] ss:$8 sps:$4 sm:$0xff]  }
 0x220   :  { %v1714_v54 = vadd.f32 %v1701_v46, %v1671_v52  ;;  %v1673_v61 = vpop.f32.mrb[7].mxu0  ;;  %v1728_v55 = vmax.f32 %v1712_v49, 0.0  ;;  %v6153_v49 = vld [vmem:[%s8101_s4 + $0x170] ss:$8 sps:$4 sm:$0xff]   ;;  %v6161_v52 = vld [vmem:[%s8101_s4 + $0x194] ss:$8 sps:$4 sm:$0xff]  }
 0x221   :  { %v1715_v13 = vadd.f32 %v1705_v53, %v1673_v61  ;;  %v1729_v57 = vmax.f32 %v1713_v51, 0.0  ;;  %v6156_v51 = vld [vmem:[%s8101_s4 + $0x180] ss:$8 sps:$4 sm:$0xff]   ;;  %v6164_v61 = vld [vmem:[%s8101_s4 + $0x1a4] ss:$8 sps:$4 sm:$0xff]  }
 0x222   :  { %v1730_v56 = vmax.f32 %v1714_v54, 0.0  ;;  %v6159_v54 = vld [vmem:[%s8101_s4 + $0x190] ss:$8 sps:$4 sm:$0xff]  }
 0x223   :  { %v1731_v58 = vmax.f32 %v1715_v13, 0.0  ;;  %v6162_v13 = vld [vmem:[%s8101_s4 + $0x1a0] ss:$8 sps:$4 sm:$0xff]  }
 0x224   :  { %v1742_v62 = vpack.c.bf16 %v1730_v56, %v1728_v55  ;;  %v6167_v55 = vld [vmem:[%s8101_s4 + $0x1b4] ss:$8 sps:$4 sm:$0xff]   ;;  %v6165_v56 = vld [vmem:[%s8101_s4 + $0x1b0] ss:$8 sps:$4 sm:$0xff]  }
 0x225   :  { %v1743_v24 = vpack.c.bf16 %v1731_v58, %v1729_v57  ;;  %v1677_v59 = vpop.f32.mrb[8].mxu0  ;;  %v6170_v57 = vld [vmem:[%s8101_s4 + $0x1c4] ss:$8 sps:$4 sm:$0xff]   ;;  %v6168_v58 = vld [vmem:[%s8101_s4 + $0x1c0] ss:$8 sps:$4 sm:$0xff]  }
 0x226   :  { %1750 = vst [vmem:[#allocation2 + $0x10] sm:$0xff] %v1742_v62  ;;  %v1716_v60 = vadd.f32 %v1701_v46, %v1677_v59  ;;  %v1679_v63 = vpop.f32.mrb[9].mxu0  ;;  %v6173_v62 = vld [vmem:[%s8101_s4 + $0x1d4] ss:$8 sps:$4 sm:$0xff]   ;;  %v6176_v59 = vld [vmem:[%s8101_s4 + $0x1e4] ss:$8 sps:$4 sm:$0xff]  }
 0x227   :  { %1751 = vst [vmem:[#allocation2 + $0x18] sm:$0xff] %v1743_v24  ;;  %v1717_v0 = vadd.f32 %v1705_v53, %v1679_v63  ;;  %v1681_v25 = vpop.f32.mrb[10].mxu0  ;;  %v6171_v24 = vld [vmem:[%s8101_s4 + $0x1d0] ss:$8 sps:$4 sm:$0xff]   ;;  %v6179_v63 = vld [vmem:[%s8101_s4 + $0x1f4] ss:$8 sps:$4 sm:$0xff]  }
 0x228   :  { %v1718_v32 = vadd.f32 %v1701_v46, %v1681_v25  ;;  %v1683_v1 = vpop.f32.mrb[11].mxu0  ;;  %v1732_v3 = vmax.f32 %v1716_v60, 0.0  ;;  %v6174_v60 = vld [vmem:[%s8101_s4 + $0x1e0] ss:$8 sps:$4 sm:$0xff]   ;;  %v6183_v25 = vld [vmem:[%s8101_s4 + $0x204] ss:$8 sps:$4 sm:$0xff]  }
 0x229   :  { %v1719_v2 = vadd.f32 %v1705_v53, %v1683_v1  ;;  %v1733_v42 = vmax.f32 %v1717_v0, 0.0  ;;  %v6177_v0 = vld [vmem:[%s8101_s4 + $0x1f0] ss:$8 sps:$4 sm:$0xff]  }
 0x22a   :  { %v1734_v33 = vmax.f32 %v1718_v32, 0.0  ;;  %v6181_v32 = vld [vmem:[%s8101_s4 + $0x200] ss:$8 sps:$4 sm:$0xff]  }
 0x22b   :  { %v1735_v14 = vmax.f32 %v1719_v2, 0.0  ;;  %v6187_v2 = vld [vmem:[%s8101_s4 + $0x214] ss:$8 sps:$4 sm:$0xff]  }
 0x22c   :  { %v1744_v37 = vpack.c.bf16 %v1734_v33, %v1732_v3  ;;  %v6185_v33 = vld [vmem:[%s8101_s4 + $0x210] ss:$8 sps:$4 sm:$0xff]  }
 0x22d   :  { %v1745_v5 = vpack.c.bf16 %v1735_v14, %v1733_v42  ;;  %v1687_v6 = vpop.f32.mrb[12].mxu0  ;;  %v6131_v38 = vld [vmem:[#allocation2] ss:$16 sps:$4 sm:$0xff]   ;;  %v6180_v1 = vld [vmem:[#allocation2 + $0x4] ss:$16 sps:$4 sm:$0xff]  }
 0x22e   :  { %1752 = vst [vmem:[#allocation2 + $0x20] sm:$0xff] %v1744_v37  ;;  %v1720_v8 = vadd.f32 %v1701_v46, %v1687_v6  ;;  %v1689_v9 = vpop.f32.mrb[13].mxu0  ;;  %v6127_v10 = vld [vmem:[#allocation2 + $0x8] ss:$16 sps:$4 sm:$0xff]   ;;  %v6140_v35 = vld [vmem:[#allocation2 + $0xc] ss:$16 sps:$4 sm:$0xff]  }
 0x22f   :  { %1753 = vst [vmem:[#allocation2 + $0x28] sm:$0xff] %v1745_v5  ;;  %v1721_v11 = vadd.f32 %v1705_v53, %v1689_v9  ;;  %v1691_v12 = vpop.f32.mrb[14].mxu0  ;;  %2756 = vmatprep.mubr.bf16.mxu1 %v6127_v10  ;;  %v6191_v42 = vld [vmem:[%s8101_s4 + $0x224] ss:$8 sps:$4 sm:$0xff]   ;;  %v6189_v14 = vld [vmem:[%s8101_s4 + $0x220] ss:$8 sps:$4 sm:$0xff]  }
 0x230   :  { %v1722_v45 = vadd.f32 %v1701_v46, %v1691_v12  ;;  %v1693_v15 = vpop.f32.mrb[15].mxu0  ;;  %2757 = vmatmul.mubr.bf16.vlgmr.msra.gmra.mrb[0].mxu1 %v6131_v38  ;;  %v1736_v17 = vmax.f32 %v1720_v8, 0.0  ;;  %v6193_v6 = vld [vmem:[%s8101_s4 + $0x230] ss:$8 sps:$4 sm:$0xff]   ;;  %v6196_v8 = vld [vmem:[%s8101_s4 + $0x240] ss:$8 sps:$4 sm:$0xff]  }
 0x231   :  { %v1723_v16 = vadd.f32 %v1705_v53, %v1693_v15  ;;  %2776 = vmatpush1.bf16.msra.mxu1 %v6128_v4  ;;  %v1737_v23 = vmax.f32 %v1721_v11, 0.0  ;;  %v6136_v53 = vld [vmem:[%s8101_s4 + $0x120] ss:$8 sps:$4 sm:$0xff]   ;;  %v6195_v4 = vld [vmem:[%s8101_s4 + $0x234] ss:$8 sps:$4 sm:$0xff]  }
 0x232   :  { %v1738_v18 = vmax.f32 %v1722_v45, 0.0  ;;  %2777 = vmatprep.subr.bf16.mxu1 %v6134_v7  ;;  %v6198_v7 = vld [vmem:[%s8101_s4 + $0x244] ss:$8 sps:$4 sm:$0xff]   ;;  %v6201_v10 = vld [vmem:[%s8101_s4 + $0x254] ss:$8 sps:$4 sm:$0xff]  }
 0x233   :  { %v1739_v27 = vmax.f32 %v1723_v16, 0.0  ;;  %v6291_v9 = vld [vmem:[%s8103_s6 + $0x140] sm:$0xff]   ;;  %v6199_v12 = vld [vmem:[%s8101_s4 + $0x250] ss:$8 sps:$4 sm:$0xff]   ;;  %v6295_v38 = vld [vmem:[%s8103_s6 + $0x148] sm:$0xff]  }
 0x234   :  { %v1746_v29 = vpack.c.bf16 %v1738_v18, %v1736_v17  ;;  %5575 = vmatprep.subr.bf16.mxu0 %v6291_v9  ;;  %v6293_v11 = vld [vmem:[%s8103_s6 + $0x100] sm:$0xff]   ;;  %v6297_v15 = vld [vmem:[%s8103_s6 + $0x108] sm:$0xff]   ;;  %v6299_v17 = vld [vmem:[%s8103_s6 + $0x150] sm:$0xff]  }
 0x235   :  { %v1747_v46 = vpack.c.bf16 %v1739_v27, %v1737_v23  ;;  %2778 = vmatpush1.bf16.msra.mxu1 %v6132_v19  ;;  %v6139_v31 = vld [vmem:[#allocation2 + $0x20] ss:$0 sps:$4 sm:$0xff]   ;;  %v6188_v37 = vld [vmem:[#allocation2 + $0x24] ss:$0 sps:$4 sm:$0xff]   ;;  %5576 = vmatpush3.bf16.msra.mxu0 %v6293_v11  ;;  %v6207_v18 = vld [vmem:[%s8101_s4 + $0x274] ss:$8 sps:$4 sm:$0xff]  }
 0x236   :  { %1754 = vst [vmem:[#allocation2 + $0x30] sm:$0xff] %v1746_v29  ;;  %v6135_v30 = vld [vmem:[#allocation2 + $0x28] ss:$0 sps:$4 sm:$0xff]   ;;  %2779 = vmatprep.subr.bf16.mxu1 %v6138_v28  ;;  %v6184_v3 = vld [vmem:[#allocation2 + $0x2c] ss:$0 sps:$4 sm:$0xff]   ;;  %5577 = vmatprep.subr.bf16.mxu0 %v6295_v38  ;;  %v6301_v19 = vld [vmem:[%s8103_s6 + $0x110] sm:$0xff]  }
 0x237   :  { %1755 = vst [vmem:[#allocation2 + $0x38] sm:$0xff] %v1747_v46  ;;  %2766 = vmatprep.mubr.bf16.mxu1 %v6135_v30  ;;  %v6192_v5 = vld [vmem:[#allocation2 + $0x18] ss:$16 sps:$4 sm:$0xff]   ;;  %v6204_v45 = vld [vmem:[%s8101_s4 + $0x264] ss:$8 sps:$4 sm:$0xff]  }
 0x238   :  { %2767 = vmatmul.mubr.bf16.gmra.mrb[4].mxu1 %v6139_v31  ;;  %v6202_v16 = vld [vmem:[%s8101_s4 + $0x260] ss:$8 sps:$4 sm:$0xff]   ;;  %v6205_v23 = vld [vmem:[%s8101_s4 + $0x270] ss:$8 sps:$4 sm:$0xff]   ;;  %v6210_v28 = vld [vmem:[%s8101_s4 + $0x284] ss:$8 sps:$4 sm:$0xff]  }
 0x239   :  { %2780 = vmatpush1.bf16.msra.mxu1 %v6136_v53  ;;  %2807 = vmatprep.mubr.bf16.mxu1 %v6140_v35  ;;  %v6303_v27 = vld [vmem:[%s8103_s6 + $0x158] sm:$0xff]   ;;  %v6208_v46 = vld [vmem:[%s8101_s4 + $0x280] ss:$8 sps:$4 sm:$0xff]   ;;  %v6216_v31 = vld [vmem:[%s8101_s4 + $0x2a4] ss:$8 sps:$4 sm:$0xff]  }
 0x23a   :  { %2781 = vmatprep.subr.bf16.mxu1 %v6143_v34  ;;  %5578 = vmatpush3.bf16.msra.mxu0 %v6297_v15  ;;  %v6305_v29 = vld [vmem:[%s8103_s6 + $0x118] sm:$0xff]   ;;  %v6214_v34 = vld [vmem:[%s8101_s4 + $0x2a0] ss:$8 sps:$4 sm:$0xff]   ;;  %v6280_v11 = vld [vmem:[%s8101_s4 + $0x3e4] ss:$8 sps:$4 sm:$0xff]  }
 0x23b   :  { %5579 = vmatprep.subr.bf16.mxu0 %v6299_v17  ;;  %v6213_v53 = vld [vmem:[%s8101_s4 + $0x294] ss:$8 sps:$4 sm:$0xff]   ;;  %v6211_v30 = vld [vmem:[%s8101_s4 + $0x290] ss:$8 sps:$4 sm:$0xff]   ;;  %v6287_v15 = vld [vmem:[%s8103_s6 + $0xc0] sm:$0xff]  }
 0x23c   :  { %v6219_v35 = vld [vmem:[%s8101_s4 + $0x2b4] ss:$8 sps:$4 sm:$0xff]  }
 0x23d   :  { %2782 = vmatpush1.bf16.msra.mxu1 %v6141_v36  ;;  %v6217_v36 = vld [vmem:[%s8101_s4 + $0x2b0] ss:$8 sps:$4 sm:$0xff]   ;;  %v6277_v9 = vld [vmem:[%s8101_s4 + $0x3d4] ss:$8 sps:$4 sm:$0xff]  }
 0x23e   :  { %2783 = vmatprep.subr.bf16.mxu1 %v6146_v39  ;;  %5580 = vmatpush3.bf16.msra.mxu0 %v6301_v19  ;;  %v6222_v39 = vld [vmem:[%s8101_s4 + $0x2c4] ss:$8 sps:$4 sm:$0xff]   ;;  %v6283_v38 = vld [vmem:[%s8101_s4 + $0x3f4] ss:$8 sps:$4 sm:$0xff]  }
 0x23f   :  { %5581 = vmatprep.subr.bf16.mxu0 %v6303_v27  ;;  %v6284_v17 = vld [vmem:[#allocation2 + $0x14] ss:$16 sps:$4 sm:$0xff]   ;;  %v6285_v19 = vld [vmem:[#allocation2 + $0x3c] ss:$0 sps:$4 sm:$0xff]  }
 0x240   :  { %v6292_v27 = vld [vmem:[%s8103_s6 + $0xd0] sm:$0xff]  }
 0x241   :  { %2784 = vmatpush1.bf16.msra.mxu1 %v6144_v40  ;;  %v6220_v40 = vld [vmem:[%s8101_s4 + $0x2c0] ss:$8 sps:$4 sm:$0xff]  }
 0x242   :  { %2785 = vmatprep.subr.bf16.mxu1 %v6149_v41  ;;  %5582 = vmatpush3.bf16.msra.mxu0 %v6305_v29  ;;  %v6225_v41 = vld [vmem:[%s8101_s4 + $0x2d4] ss:$8 sps:$4 sm:$0xff]  }
 0x243   :  { %v6286_v29 = vld [vmem:[#allocation2 + $0x34] ss:$0 sps:$4 sm:$0xff]  }
 0x245   :  { %2786 = vmatpush1.bf16.msra.mxu1 %v6147_v43  ;;  %v6223_v43 = vld [vmem:[%s8101_s4 + $0x2d0] ss:$8 sps:$4 sm:$0xff]  }
 0x246   :  { %2787 = vmatprep.subr.bf16.mxu1 %v6152_v44  ;;  %v6228_v44 = vld [vmem:[%s8101_s4 + $0x2e4] ss:$8 sps:$4 sm:$0xff]  }
 0x249   :  { %2788 = vmatpush1.bf16.msra.mxu1 %v6150_v47  ;;  %v6226_v47 = vld [vmem:[%s8101_s4 + $0x2e0] ss:$8 sps:$4 sm:$0xff]  }
 0x24a   :  { %2789 = vmatprep.subr.bf16.mxu1 %v6155_v48  ;;  %v6231_v48 = vld [vmem:[%s8101_s4 + $0x2f4] ss:$8 sps:$4 sm:$0xff]  }
 0x24d   :  { %2790 = vmatpush1.bf16.msra.mxu1 %v6153_v49  ;;  %v6229_v49 = vld [vmem:[%s8101_s4 + $0x2f0] ss:$8 sps:$4 sm:$0xff]  }
 0x24e   :  { %2791 = vmatprep.subr.bf16.mxu1 %v6158_v50  ;;  %v6235_v50 = vld [vmem:[%s8101_s4 + $0x304] ss:$8 sps:$4 sm:$0xff]  }
 0x251   :  { %2792 = vmatpush1.bf16.msra.mxu1 %v6156_v51  ;;  %v6233_v51 = vld [vmem:[%s8101_s4 + $0x300] ss:$8 sps:$4 sm:$0xff]  }
 0x252   :  { %2793 = vmatprep.subr.bf16.mxu1 %v6161_v52  ;;  %v6232_v52 = vld [vmem:[#allocation2 + $0x10] ss:$16 sps:$4 sm:$0xff]  }
 0x255   :  { %2794 = vmatpush1.bf16.msra.mxu1 %v6159_v54  ;;  %v6239_v54 = vld [vmem:[%s8101_s4 + $0x314] ss:$8 sps:$4 sm:$0xff]  }
 0x256   :  { %2795 = vmatprep.subr.bf16.mxu1 %v6164_v61  ;;  %v6236_v61 = vld [vmem:[#allocation2 + $0x38] ss:$0 sps:$4 sm:$0xff]  }
 0x259   :  { %2796 = vmatpush1.bf16.msra.mxu1 %v6162_v13  ;;  %v6237_v13 = vld [vmem:[%s8101_s4 + $0x310] ss:$8 sps:$4 sm:$0xff]  }
 0x25a   :  { %2797 = vmatprep.subr.bf16.mxu1 %v6167_v55  ;;  %v6243_v55 = vld [vmem:[%s8101_s4 + $0x324] ss:$8 sps:$4 sm:$0xff]  }
 0x25d   :  { %2798 = vmatpush1.bf16.msra.mxu1 %v6165_v56  ;;  %v6241_v56 = vld [vmem:[%s8101_s4 + $0x320] ss:$8 sps:$4 sm:$0xff]  }
 0x25e   :  { %2799 = vmatprep.subr.bf16.mxu1 %v6170_v57  ;;  %v6240_v57 = vld [vmem:[#allocation2 + $0x30] ss:$0 sps:$4 sm:$0xff]  }
 0x261   :  { %2800 = vmatpush1.bf16.msra.mxu1 %v6168_v58  ;;  %v6247_v58 = vld [vmem:[%s8101_s4 + $0x334] ss:$8 sps:$4 sm:$0xff]  }
 0x262   :  { %2801 = vmatprep.subr.bf16.mxu1 %v6173_v62  ;;  %v6244_v62 = vld [vmem:[#allocation2 + $0x1c] ss:$16 sps:$4 sm:$0xff]  }
 0x265   :  { %2802 = vmatpush1.bf16.msra.mxu1 %v6171_v24  ;;  %v6245_v24 = vld [vmem:[%s8101_s4 + $0x330] ss:$8 sps:$4 sm:$0xff]  }
 0x266   :  { %2803 = vmatprep.subr.bf16.mxu1 %v6176_v59  ;;  %v6250_v59 = vld [vmem:[%s8101_s4 + $0x344] ss:$8 sps:$4 sm:$0xff]  }
 0x269   :  { %2804 = vmatpush1.bf16.msra.mxu1 %v6174_v60  ;;  %v6248_v60 = vld [vmem:[%s8101_s4 + $0x340] ss:$8 sps:$4 sm:$0xff]  }
 0x26a   :  { %2805 = vmatprep.subr.bf16.mxu1 %v6179_v63  ;;  %v6253_v63 = vld [vmem:[%s8101_s4 + $0x354] ss:$8 sps:$4 sm:$0xff]  }
 0x26d   :  { %2806 = vmatpush1.bf16.msra.mxu1 %v6177_v0  ;;  %v6251_v0 = vld [vmem:[%s8101_s4 + $0x350] ss:$8 sps:$4 sm:$0xff]  }
 0x26e   :  { %2826 = vmatprep.subr.bf16.mxu1 %v6183_v25  ;;  %v6256_v25 = vld [vmem:[%s8101_s4 + $0x364] ss:$8 sps:$4 sm:$0xff]  }
 0x270   :  { %2808 = vmatmul.mubr.bf16.vlgmr.msra.gmra.mrb[0].mxu1 %v6180_v1  ;;  %v6259_v1 = vld [vmem:[%s8101_s4 + $0x374] ss:$8 sps:$4 sm:$0xff]  }
 0x271   :  { %2817 = vmatprep.mubr.bf16.mxu1 %v6184_v3  ;;  %2827 = vmatpush1.bf16.msra.mxu1 %v6181_v32  ;;  %v6254_v32 = vld [vmem:[%s8101_s4 + $0x360] ss:$8 sps:$4 sm:$0xff]   ;;  %v6262_v3 = vld [vmem:[%s8101_s4 + $0x384] ss:$8 sps:$4 sm:$0xff]  }
 0x272   :  { %2828 = vmatprep.subr.bf16.mxu1 %v6187_v2  ;;  %v6257_v2 = vld [vmem:[%s8101_s4 + $0x370] ss:$8 sps:$4 sm:$0xff]  }
 0x275   :  { %2829 = vmatpush1.bf16.msra.mxu1 %v6185_v33  ;;  %v6260_v33 = vld [vmem:[%s8101_s4 + $0x380] ss:$8 sps:$4 sm:$0xff]  }
 0x276   :  { %2830 = vmatprep.subr.bf16.mxu1 %v6191_v42  ;;  %v6265_v42 = vld [vmem:[%s8101_s4 + $0x394] ss:$8 sps:$4 sm:$0xff]  }
 0x278   :  { %2818 = vmatmul.mubr.bf16.gmra.mrb[4].mxu1 %v6188_v37  ;;  %v6268_v37 = vld [vmem:[%s8101_s4 + $0x3a4] ss:$8 sps:$4 sm:$0xff]  }
 0x279   :  { %2831 = vmatpush1.bf16.msra.mxu1 %v6189_v14  ;;  %2858 = vmatprep.mubr.bf16.mxu1 %v6192_v5  ;;  %v6263_v14 = vld [vmem:[%s8101_s4 + $0x390] ss:$8 sps:$4 sm:$0xff]   ;;  %v6271_v5 = vld [vmem:[%s8101_s4 + $0x3b4] ss:$8 sps:$4 sm:$0xff]  }
 0x27a   :  { %2832 = vmatprep.subr.bf16.mxu1 %v6195_v4  ;;  %v6266_v4 = vld [vmem:[%s8101_s4 + $0x3a0] ss:$8 sps:$4 sm:$0xff]  }
 0x27d   :  { %2833 = vmatpush1.bf16.msra.mxu1 %v6193_v6  ;;  %v6269_v6 = vld [vmem:[%s8101_s4 + $0x3b0] ss:$8 sps:$4 sm:$0xff]  }
 0x27e   :  { %2834 = vmatprep.subr.bf16.mxu1 %v6198_v7  ;;  %v6274_v7 = vld [vmem:[%s8101_s4 + $0x3c4] ss:$8 sps:$4 sm:$0xff]  }
 0x281   :  { %2835 = vmatpush1.bf16.msra.mxu1 %v6196_v8  ;;  %v6272_v8 = vld [vmem:[%s8101_s4 + $0x3c0] ss:$8 sps:$4 sm:$0xff]  }
 0x282   :  { %2836 = vmatprep.subr.bf16.mxu1 %v6201_v10  ;;  %v6275_v10 = vld [vmem:[%s8101_s4 + $0x3d0] ss:$8 sps:$4 sm:$0xff]  }
 0x285   :  { %2837 = vmatpush1.bf16.msra.mxu1 %v6199_v12  ;;  %v6278_v12 = vld [vmem:[%s8101_s4 + $0x3e0] ss:$8 sps:$4 sm:$0xff]  }
 0x286   :  { %2838 = vmatprep.subr.bf16.mxu1 %v6204_v45  ;;  %v6281_v45 = vld [vmem:[%s8101_s4 + $0x3f0] ss:$8 sps:$4 sm:$0xff]  }
 0x289   :  { %2839 = vmatpush1.bf16.msra.mxu1 %v6202_v16  ;;  %v6288_v16 = vld [vmem:[%s8103_s6 + $0x80] sm:$0xff]  }
 0x28a   :  { %2840 = vmatprep.subr.bf16.mxu1 %v6207_v18  ;;  %v6289_v18 = vld [vmem:[%s8103_s6 + $0xc8] sm:$0xff]  }
 0x28d   :  { %2841 = vmatpush1.bf16.msra.mxu1 %v6205_v23  ;;  %v6290_v23 = vld [vmem:[%s8103_s6 + $0x88] sm:$0xff]  }
 0x28e   :  { %2842 = vmatprep.subr.bf16.mxu1 %v6210_v28  ;;  %v6294_v28 = vld [vmem:[%s8103_s6 + $0x90] sm:$0xff]  }
 0x291   :  { %2843 = vmatpush1.bf16.msra.mxu1 %v6208_v46  ;;  %v6296_v46 = vld [vmem:[%s8103_s6 + $0xd8] sm:$0xff]  }
 0x292   :  { %2844 = vmatprep.subr.bf16.mxu1 %v6213_v53  ;;  %v6298_v53 = vld [vmem:[%s8103_s6 + $0x98] sm:$0xff]  }
 0x295   :  { %2845 = vmatpush1.bf16.msra.mxu1 %v6211_v30  ;;  %v6300_v30 = vld [vmem:[%s8103_s6 + $0xe0] sm:$0xff]  }
 0x296   :  { %2846 = vmatprep.subr.bf16.mxu1 %v6216_v31  ;;  %v6302_v31 = vld [vmem:[%s8103_s6 + $0xa0] sm:$0xff]  }
 0x299   :  { %2847 = vmatpush1.bf16.msra.mxu1 %v6214_v34  ;;  %v6304_v34 = vld [vmem:[%s8103_s6 + $0xe8] sm:$0xff]  }
 0x29a   :  { %2848 = vmatprep.subr.bf16.mxu1 %v6219_v35  ;;  %v6306_v35 = vld [vmem:[%s8103_s6 + $0xa8] sm:$0xff]  }
 0x29d   :  { %2849 = vmatpush1.bf16.msra.mxu1 %v6217_v36  ;;  %v6307_v36 = vld [vmem:[%s8103_s6 + $0x160] sm:$0xff]  }
 0x29e   :  { %2850 = vmatprep.subr.bf16.mxu1 %v6222_v39  ;;  %v6308_v39 = vld [vmem:[%s8103_s6 + $0xf0] sm:$0xff]   ;;  %5583 = vmatprep.subr.bf16.mxu0 %v6307_v36 }
 0x2a1   :  { %2851 = vmatpush1.bf16.msra.mxu1 %v6220_v40  ;;  %v6309_v40 = vld [vmem:[%s8103_s6 + $0x120] sm:$0xff]  }
 0x2a2   :  { %2852 = vmatprep.subr.bf16.mxu1 %v6225_v41  ;;  %v6310_v41 = vld [vmem:[%s8103_s6 + $0xb0] sm:$0xff]   ;;  %5584 = vmatpush3.bf16.msra.mxu0 %v6309_v40  ;;  %v3503_v40 = vld [vmem:[%s8105_s8 + $0x28] sm:$0xff] }
 0x2a5   :  { %2853 = vmatpush1.bf16.msra.mxu1 %v6223_v43  ;;  %v6311_v43 = vld [vmem:[%s8103_s6 + $0x168] sm:$0xff]  }
 0x2a6   :  { %2854 = vmatprep.subr.bf16.mxu1 %v6228_v44  ;;  %v6312_v44 = vld [vmem:[%s8103_s6 + $0xf8] sm:$0xff]   ;;  %5585 = vmatprep.subr.bf16.mxu0 %v6311_v43  ;;  %v3510_v43 = vld [vmem:[%s8105_s8 + $0x60] sm:$0xff] }
 0x2a9   :  { %2855 = vmatpush1.bf16.msra.mxu1 %v6226_v47  ;;  %v6313_v47 = vld [vmem:[%s8103_s6 + $0x128] sm:$0xff]  }
 0x2aa   :  { %2856 = vmatprep.subr.bf16.mxu1 %v6231_v48  ;;  %v6314_v48 = vld [vmem:[%s8103_s6 + $0xb8] sm:$0xff]   ;;  %5586 = vmatpush3.bf16.msra.mxu0 %v6313_v47 }
 0x2ad   :  { %2857 = vmatpush1.bf16.msra.mxu1 %v6229_v49  ;;  %v6315_v49 = vld [vmem:[%s8103_s6 + $0x170] sm:$0xff]  }
 0x2ae   :  { %2877 = vmatprep.subr.bf16.mxu1 %v6235_v50  ;;  %v6316_v50 = vld [vmem:[%s8103_s6 + $0x40] sm:$0xff]   ;;  %5587 = vmatprep.subr.bf16.mxu0 %v6315_v49  ;;  %v3507_v49 = vld [vmem:[%s8105_s8 + $0x48] sm:$0xff] }
 0x2b0   :  { %2859 = vmatmul.mubr.bf16.vlgmr.msra.gmra.mrb[0].mxu1 %v6232_v52  ;;  %v6319_v52 = vld [vmem:[%s8103_s6 + $0x178] sm:$0xff]  }
 0x2b1   :  { %2868 = vmatprep.mubr.bf16.mxu1 %v6236_v61  ;;  %2878 = vmatpush1.bf16.msra.mxu1 %v6233_v51  ;;  %v6317_v51 = vld [vmem:[%s8103_s6 + $0x130] sm:$0xff]   ;;  %v2004_v61 = vld [vmem:[%s8104_s5] sm:$0x3] }
 0x2b2   :  { %2879 = vmatprep.subr.bf16.mxu1 %v6239_v54  ;;  %5588 = vmatpush3.bf16.msra.mxu0 %v6317_v51  ;;  %v6321_v54 = vld [vmem:[%s8103_s6 + $0x138] sm:$0xff]   ;;  %v3514_v51 = vld [vmem:[%s8105_s8 + $0x80] sm:$0xff] }
 0x2b3   :  { %5589 = vmatprep.subr.bf16.mxu0 %v6319_v52 }
 0x2b5   :  { %2880 = vmatpush1.bf16.msra.mxu1 %v6237_v13  ;;  %v2013_v13 = vrot.slane %v2004_v61, %v7234_v26 }
 0x2b6   :  { %2881 = vmatprep.subr.bf16.mxu1 %v6243_v55  ;;  %5590 = vmatpush3.bf16.msra.mxu0 %v6321_v54  ;;  %v3518_v54 = vld [vmem:[%s8105_s8 + $0xa0] sm:$0xff] }
 0x2b8   :  { %2869 = vmatmul.mubr.bf16.gmra.mrb[4].mxu1 %v6240_v57 }
 0x2b9   :  { %2882 = vmatpush1.bf16.msra.mxu1 %v6241_v56  ;;  %2909 = vmatprep.mubr.bf16.mxu1 %v6244_v62  ;;  %v2009_v56 = vrot.slane %v2004_v61, %v7228_v21  ;;  %v3515_v61 = vld [vmem:[%s8105_s8 + $0x88] sm:$0xff] }
 0x2ba   :  { %2883 = vmatprep.subr.bf16.mxu1 %v6247_v58 }
 0x2bd   :  { %2884 = vmatpush1.bf16.msra.mxu1 %v6245_v24 }
 0x2be   :  { %2885 = vmatprep.subr.bf16.mxu1 %v6250_v59 }
 0x2c1   :  { %2886 = vmatpush1.bf16.msra.mxu1 %v6248_v60 }
 0x2c2   :  { %2887 = vmatprep.subr.bf16.mxu1 %v6253_v63 }
 0x2c5   :  { %2888 = vmatpush1.bf16.msra.mxu1 %v6251_v0 }
 0x2c6   :  { %2889 = vmatprep.subr.bf16.mxu1 %v6256_v25 }
 0x2c9   :  { %2890 = vmatpush1.bf16.msra.mxu1 %v6254_v32 }
 0x2ca   :  { %2891 = vmatprep.subr.bf16.mxu1 %v6259_v1 }
 0x2cd   :  { %2892 = vmatpush1.bf16.msra.mxu1 %v6257_v2  ;;  %v6318_v2 = vld [vmem:[%s8103_s6] sm:$0xff]  }
 0x2ce   :  { %2893 = vmatprep.subr.bf16.mxu1 %v6262_v3 }
 0x2d1   :  { %2894 = vmatpush1.bf16.msra.mxu1 %v6260_v33 }
 0x2d2   :  { %2895 = vmatprep.subr.bf16.mxu1 %v6265_v42 }
 0x2d5   :  { %2896 = vmatpush1.bf16.msra.mxu1 %v6263_v14  ;;  %v6320_v14 = vld [vmem:[%s8103_s6 + $0x48] sm:$0xff]  }
 0x2d6   :  { %2897 = vmatprep.subr.bf16.mxu1 %v6268_v37 }
 0x2d9   :  { %2898 = vmatpush1.bf16.msra.mxu1 %v6266_v4 }
 0x2da   :  { %2899 = vmatprep.subr.bf16.mxu1 %v6271_v5 }
 0x2dd   :  { %2900 = vmatpush1.bf16.msra.mxu1 %v6269_v6 }
 0x2de   :  { %2901 = vmatprep.subr.bf16.mxu1 %v6274_v7 }
 0x2e1   :  { %2902 = vmatpush1.bf16.msra.mxu1 %v6272_v8 }
 0x2e2   :  { %2903 = vmatprep.subr.bf16.mxu1 %v6277_v9  ;;  %v6322_v9 = vld [vmem:[%s8103_s6 + $0x8] sm:$0xff]  }
 0x2e5   :  { %2904 = vmatpush1.bf16.msra.mxu1 %v6275_v10  ;;  %v6323_v10 = vld [vmem:[%s8103_s6 + $0x50] sm:$0xff]  }
 0x2e6   :  { %2905 = vmatprep.subr.bf16.mxu1 %v6280_v11 }
 0x2e9   :  { %2906 = vmatpush1.bf16.msra.mxu1 %v6278_v12 }
 0x2ea   :  { %2907 = vmatprep.subr.bf16.mxu1 %v6283_v38  ;;  %v6324_v38 = vld [vmem:[%s8103_s6 + $0x10] sm:$0xff]  }
 0x2ed   :  { %2908 = vmatpush1.bf16.msra.mxu1 %v6281_v45  ;;  %v6325_v45 = vld [vmem:[%s8103_s6 + $0x58] sm:$0xff]  }
 0x2ee   :  { %5531 = vmatprep.subr.bf16.mxu1 %v6287_v15  ;;  %v6326_v15 = vld [vmem:[%s8103_s6 + $0x18] sm:$0xff]  }
 0x2f0   :  { %2910 = vmatmul.mubr.bf16.vlgmr.msra.gmra.mrb[0].mxu1 %v6284_v17  ;;  %v6328_v17 = vld [vmem:[%s8103_s6 + $0x20] sm:$0xff]  }
 0x2f1   :  { %2919 = vmatprep.mubr.bf16.mxu1 %v6285_v19  ;;  %5532 = vmatpush3.bf16.msra.mxu1 %v6288_v16  ;;  %v6327_v16 = vld [vmem:[%s8103_s6 + $0x60] sm:$0xff]   ;;  %v6330_v19 = vld [vmem:[%s8103_s6 + $0x28] sm:$0xff]  }
 0x2f2   :  { %5533 = vmatprep.subr.bf16.mxu1 %v6289_v18  ;;  %v6329_v18 = vld [vmem:[%s8103_s6 + $0x68] sm:$0xff]  }
 0x2f5   :  { %5534 = vmatpush3.bf16.msra.mxu1 %v6290_v23  ;;  %v6331_v23 = vld [vmem:[%s8103_s6 + $0x70] sm:$0xff]  }
 0x2f6   :  { %5535 = vmatprep.subr.bf16.mxu1 %v6292_v27  ;;  %v6332_v27 = vld [vmem:[%s8103_s6 + $0x30] sm:$0xff]  }
 0x2f8   :  { %2920 = vmatmul.mubr.bf16.gmra.mrb[4].mxu1 %v6286_v29  ;;  %v6333_v29 = vld [vmem:[%s8103_s6 + $0x78] sm:$0xff]  }
 0x2f9   :  { %5536 = vmatpush3.bf16.msra.mxu1 %v6294_v28 }
 0x2fa   :  { %5537 = vmatprep.subr.bf16.mxu1 %v6296_v46  ;;  %v6334_v46 = vld [vmem:[%s8103_s6 + $0x38] sm:$0xff]  }
 0x2fd   :  { %5538 = vmatpush3.bf16.msra.mxu1 %v6298_v53 }
 0x2fe   :  { %5539 = vmatprep.subr.bf16.mxu1 %v6300_v30 }
 0x301   :  { %5540 = vmatpush3.bf16.msra.mxu1 %v6302_v31  ;;  %v3498_v31 = vld [vmem:[%s8105_s8] sm:$0xff] }
 0x302   :  { %5541 = vmatprep.subr.bf16.mxu1 %v6304_v34  ;;  %v3502_v34 = vld [vmem:[%s8105_s8 + $0x20] sm:$0xff] }
 0x303   :  { %v5352_v36 = vcombine.low %v3498_v31, %v3502_v34 }
 0x305   :  { %5542 = vmatpush3.bf16.msra.mxu1 %v6306_v35  ;;  %v3499_v35 = vld [vmem:[%s8105_s8 + $0x8] sm:$0xff] }
 0x306   :  { %5543 = vmatprep.subr.bf16.mxu1 %v6308_v39  ;;  %v5353_v39 = vcombine.high %v3498_v31, %v3502_v34  ;;  %v5355_v47 = vcombine.high %v3499_v35, %v3503_v40  ;;  %v3559_v34 = vld [vmem:[%s8105_s8 + $0x1e8] sm:$0xff] }
 0x308   :  { %3965 = vmatprep.subr.bf16.mxu0 %v5355_v47  ;;  %v3505_v47 = vld [vmem:[%s8105_s8 + $0x38] sm:$0xff] }
 0x309   :  { %5544 = vmatpush3.bf16.msra.mxu1 %v6310_v41  ;;  %v3506_v41 = vld [vmem:[%s8105_s8 + $0x40] sm:$0xff] }
 0x30a   :  { %5545 = vmatprep.subr.bf16.mxu1 %v6312_v44  ;;  %v5354_v44 = vcombine.low %v3499_v35, %v3503_v40  ;;  %v3500_v35 = vld [vmem:[%s8105_s8 + $0x10] sm:$0xff] }
 0x30d   :  { %5546 = vmatpush3.bf16.msra.mxu1 %v6314_v48  ;;  %v5361_v48 = vcombine.high %v3506_v41, %v3510_v43 }
 0x30e   :  { %5553 = vmatprep.subr.bf16.mxu1 %v6316_v50  ;;  %v3511_v50 = vld [vmem:[%s8105_s8 + $0x68] sm:$0xff] }
 0x30f   :  { %v5363_v52 = vcombine.high %v3507_v49, %v3511_v50 }
 0x3c3   :  { %v2911_v55 = vpop.f32.mrb[0].mxu1 }
 0x3c4   :  { %v2913_v57 = vpop.f32.mrb[1].mxu1  ;;  %v5685_v28 = vadd.f32 %v2911_v55, %v2009_v56  ;;  %v5360_v55 = vcombine.low %v3506_v41, %v3510_v43 }
 0x3c5   :  { %v5686_v58 = vadd.f32 %v2913_v57, %v2013_v13  ;;  %v2915_v62 = vpop.f32.mrb[2].mxu1  ;;  %v5369_v57 = vcombine.high %v3514_v51, %v3518_v54 }
 0x3c6   :  { %v5687_v24 = vadd.f32 %v2915_v62, %v2009_v56  ;;  %v2917_v59 = vpop.f32.mrb[3].mxu1  ;;  %v2928_v53 = vmax.f32 %v5685_v28, 0.0  ;;  %v3522_v62 = vld [vmem:[%s8105_s8 + $0xc0] sm:$0xff] }
 0x3c7   :  { %v5688_v60 = vadd.f32 %v2917_v59, %v2013_v13  ;;  %v2929_v0 = vmax.f32 %v5686_v58, 0.0  ;;  %v3523_v59 = vld [vmem:[%s8105_s8 + $0xc8] sm:$0xff] }
 0x3c8   :  { %v2930_v63 = vmax.f32 %v5687_v24, 0.0  ;;  %v5519_v30 = vpack.c.bf16 %v2928_v53, %v2928_v53  ;;  %v3526_v24 = vld [vmem:[%s8105_s8 + $0xe0] sm:$0xff]  ;;  %v3555_v53 = vld [vmem:[%s8105_s8 + $0x1c8] sm:$0xff] }
 0x3c9   :  { %v2931_v25 = vmax.f32 %v5688_v60, 0.0  ;;  %v5520_v37 = vpack.c.bf16 %v2929_v0, %v2929_v0  ;;  %v3527_v60 = vld [vmem:[%s8105_s8 + $0xe8] sm:$0xff]  ;;  %v5411_v40 = vcombine.high %v3555_v53, %v3559_v34 }
 0x3ca   :  { %v5517_v3 = vpack.c.bf16 %v2930_v63, %v2930_v63  ;;  %v5368_v63 = vcombine.low %v3514_v51, %v3518_v54 }
 0x3cb   :  { %v5518_v32 = vpack.c.bf16 %v2931_v25, %v2931_v25  ;;  %v2921_v1 = vpop.f32.mrb[4].mxu1  ;;  %v5377_v25 = vcombine.high %v3522_v62, %v3526_v24 }
 0x3cc   :  { %v5689_v33 = vadd.f32 %v2921_v1, %v2009_v56  ;;  %v2923_v42 = vpop.f32.mrb[5].mxu1  ;;  %v5362_v56 = vcombine.low %v3507_v49, %v3511_v50  ;;  %v3530_v1 = vld [vmem:[%s8105_s8 + $0x100] sm:$0xff] }
 0x3cd   :  { %v5690_v4 = vadd.f32 %v2923_v42, %v2013_v13  ;;  %v2925_v5 = vpop.f32.mrb[6].mxu1  ;;  %3159 = vmatprep.mubr.bf16.mxu1 %v5518_v32  ;;  %v3519_v13 = vld [vmem:[%s8105_s8 + $0xa8] sm:$0xff]  ;;  %v5379_v32 = vcombine.high %v3523_v59, %v3527_v60  ;;  %v5376_v42 = vcombine.low %v3522_v62, %v3526_v24 }
 0x3ce   :  { %v2932_v6 = vmax.f32 %v5689_v33, 0.0  ;;  %v2926_v7 = vpop.f32.mrb[7].mxu1  ;;  %3160 = vmatmul.mubr.bf16.vlgmr.msra.gmra.mrb[8].mxu1 %v5517_v3  ;;  %v5371_v58 = vcombine.high %v3515_v61, %v3519_v13  ;;  %v5370_v0 = vcombine.low %v3515_v61, %v3519_v13  ;;  %v3531_v3 = vld [vmem:[%s8105_s8 + $0x108] sm:$0xff] }
 0x3cf   :  { %v2933_v8 = vmax.f32 %v5690_v4, 0.0  ;;  %5554 = vmatpush3.bf16.msra.mxu1 %v6318_v2  ;;  %3302 = vmatprep.mubr.bf16.mxu1 %v5520_v37  ;;  %v3534_v2 = vld [vmem:[%s8105_s8 + $0x120] sm:$0xff]  ;;  %v3535_v33 = vld [vmem:[%s8105_s8 + $0x128] sm:$0xff] }
 0x3d0   :  { %5555 = vmatprep.subr.bf16.mxu1 %v6320_v14  ;;  %v5521_v12 = vpack.c.bf16 %v2932_v6, %v2932_v6  ;;  %v5378_v14 = vcombine.low %v3523_v59, %v3527_v60  ;;  %v5385_v37 = vcombine.high %v3530_v1, %v3534_v2  ;;  %v5387_v4 = vcombine.high %v3531_v3, %v3535_v33  ;;  %v3538_v7 = vld [vmem:[%s8105_s8 + $0x140] sm:$0xff] }
 0x3d1   :  { %v5522_v11 = vpack.c.bf16 %v2933_v8, %v2933_v8  ;;  %v5384_v5 = vcombine.low %v3530_v1, %v3534_v2  ;;  %v5386_v6 = vcombine.low %v3531_v3, %v3535_v33  ;;  %v3542_v8 = vld [vmem:[%s8105_s8 + $0x160] sm:$0xff]  ;;  %v3508_v2 = vld [vmem:[%s8105_s8 + $0x50] sm:$0xff]  ;;  %v3509_v33 = vld [vmem:[%s8105_s8 + $0x58] sm:$0xff] }
 0x3d2   :  { %v3512_v3 = vld [vmem:[%s8105_s8 + $0x70] sm:$0xff] }
 0x3d3   :  { %5556 = vmatpush3.bf16.msra.mxu1 %v6322_v9  ;;  %3479 = vmatprep.mubr.bf16.mxu0 %v5522_v11  ;;  %v3539_v9 = vld [vmem:[%s8105_s8 + $0x148] sm:$0xff] }
 0x3d4   :  { %3480 = vmatmul.mubr.bf16.vlgmr.msra.gmra.mrb[16].mxu0 %v5521_v12  ;;  %5557 = vmatprep.subr.bf16.mxu1 %v6323_v10  ;;  %v5393_v10 = vcombine.high %v3538_v7, %v3542_v8  ;;  %v3543_v11 = vld [vmem:[%s8105_s8 + $0x168] sm:$0xff]  ;;  %v5392_v12 = vcombine.low %v3538_v7, %v3542_v8  ;;  %v3520_v7 = vld [vmem:[%s8105_s8 + $0xb0] sm:$0xff]  ;;  %v3517_v8 = vld [vmem:[%s8105_s8 + $0x98] sm:$0xff] }
 0x3d5   :  { %3997 = vmatprep.mubr.bf16.mxu0 %v6403_v22  ;;  %3966 = vmatpush1.bf16.msra.mxu0 %v5354_v44  ;;  %v3501_v44 = vld [vmem:[%s8105_s8 + $0x18] sm:$0xff] }
 0x3d6   :  { %3967 = vmatprep.subr.bf16.mxu0 %v5363_v52  ;;  %v5359_v49 = vcombine.high %v3501_v44, %v3505_v47 }
 0x3d7   :  { %5558 = vmatpush3.bf16.msra.mxu1 %v6324_v38  ;;  %v5394_v38 = vcombine.low %v3539_v9, %v3543_v11 }
 0x3d8   :  { %5559 = vmatprep.subr.bf16.mxu1 %v6325_v45  ;;  %v5395_v45 = vcombine.high %v3539_v9, %v3543_v11  ;;  %v3521_v9 = vld [vmem:[%s8105_s8 + $0xb8] sm:$0xff] }
 0x3d9   :  { %3968 = vmatpush1.bf16.msra.mxu0 %v5362_v56 }
 0x3da   :  { %3969 = vmatprep.subr.bf16.mxu0 %v5371_v58 }
 0x3db   :  { %5560 = vmatpush3.bf16.msra.mxu1 %v6326_v15  ;;  %v3546_v15 = vld [vmem:[%s8105_s8 + $0x180] sm:$0xff] }
 0x3dc   :  { %5561 = vmatprep.subr.bf16.mxu1 %v6327_v16  ;;  %v3550_v16 = vld [vmem:[%s8105_s8 + $0x1a0] sm:$0xff] }
 0x3dd   :  { %3970 = vmatpush1.bf16.msra.mxu0 %v5370_v0 }
 0x3de   :  { %3971 = vmatprep.subr.bf16.mxu0 %v5379_v32 }
 0x3df   :  { %5562 = vmatpush3.bf16.msra.mxu1 %v6328_v17  ;;  %v3547_v17 = vld [vmem:[%s8105_s8 + $0x188] sm:$0xff] }
 0x3e0   :  { %5563 = vmatprep.subr.bf16.mxu1 %v6329_v18  ;;  %v5401_v18 = vcombine.high %v3546_v15, %v3550_v16 }
 0x3e1   :  { %3972 = vmatpush1.bf16.msra.mxu0 %v5378_v14 }
 0x3e2   :  { %3973 = vmatprep.subr.bf16.mxu0 %v5387_v4  ;;  %v5365_v4 = vcombine.high %v3508_v2, %v3512_v3 }
 0x3e3   :  { %5564 = vmatpush3.bf16.msra.mxu1 %v6330_v19  ;;  %v3551_v19 = vld [vmem:[%s8105_s8 + $0x1a8] sm:$0xff] }
 0x3e4   :  { %5565 = vmatprep.subr.bf16.mxu1 %v6331_v23  ;;  %v5400_v23 = vcombine.low %v3546_v15, %v3550_v16  ;;  %v5403_v28 = vcombine.high %v3547_v17, %v3551_v19  ;;  %v3528_v15 = vld [vmem:[%s8105_s8 + $0xf0] sm:$0xff]  ;;  %v3525_v16 = vld [vmem:[%s8105_s8 + $0xd8] sm:$0xff] }
 0x3e5   :  { %3974 = vmatpush1.bf16.msra.mxu0 %v5386_v6  ;;  %v3516_v6 = vld [vmem:[%s8105_s8 + $0x90] sm:$0xff] }
 0x3e6   :  { %3975 = vmatprep.subr.bf16.mxu0 %v5395_v45  ;;  %v3524_v45 = vld [vmem:[%s8105_s8 + $0xd0] sm:$0xff] }
 0x3e7   :  { %5566 = vmatpush3.bf16.msra.mxu1 %v6332_v27  ;;  %v5402_v27 = vcombine.low %v3547_v17, %v3551_v19  ;;  %v3529_v17 = vld [vmem:[%s8105_s8 + $0xf8] sm:$0xff]  ;;  %v5374_v19 = vcombine.low %v3517_v8, %v3521_v9 }
 0x3e8   :  { %5567 = vmatprep.subr.bf16.mxu1 %v6333_v29  ;;  %v3554_v29 = vld [vmem:[%s8105_s8 + $0x1c0] sm:$0xff] }
 0x3e9   :  { %3976 = vmatpush1.bf16.msra.mxu0 %v5394_v38  ;;  %v5375_v38 = vcombine.high %v3517_v8, %v3521_v9  ;;  %v6348_v8 = vld [vmem:[%s8106_s10 + $0xd8] sm:$0xff]  }
 0x3ea   :  { %3977 = vmatprep.subr.bf16.mxu0 %v5403_v28  ;;  %v3532_v28 = vld [vmem:[%s8105_s8 + $0x110] sm:$0xff]  ;;  %v6349_v9 = vld [vmem:[%s8106_s10 + $0x18] sm:$0xff]  }
 0x3eb   :  { %5568 = vmatpush3.bf16.msra.mxu1 %v6334_v46  ;;  %v3558_v46 = vld [vmem:[%s8105_s8 + $0x1e0] sm:$0xff] }
 0x3ec   :  { %3924 = vmatprep.subr.bf16.mxu1 %v5353_v39  ;;  %v5409_v31 = vcombine.high %v3554_v29, %v3558_v46  ;;  %v5410_v39 = vcombine.low %v3555_v53, %v3559_v34  ;;  %v5380_v53 = vcombine.low %v3524_v45, %v3528_v15 }
 0x3ed   :  { %3978 = vmatpush1.bf16.msra.mxu0 %v5402_v27  ;;  %v5383_v27 = vcombine.high %v3525_v16, %v3529_v17 }
 0x3ee   :  { %3303 = vmatmul.mubr.bf16.vlgmr.msra.gmra.mrb[12].mxu1 %v5519_v30  ;;  %v5408_v30 = vcombine.low %v3554_v29, %v3558_v46  ;;  %3979 = vmatprep.subr.bf16.mxu0 %v5411_v40  ;;  %v3536_v29 = vld [vmem:[%s8105_s8 + $0x130] sm:$0xff]  ;;  %v3537_v46 = vld [vmem:[%s8105_s8 + $0x138] sm:$0xff] }
 0x3ef   :  { %3956 = vmatprep.mubr.bf16.mxu1 %v6403_v22  ;;  %3925 = vmatpush1.bf16.msra.mxu1 %v5352_v36  ;;  %v3504_v36 = vld [vmem:[%s8105_s8 + $0x30] sm:$0xff]  ;;  %v3545_v40 = vld [vmem:[%s8105_s8 + $0x178] sm:$0xff] }
 0x3f0   :  { %3926 = vmatprep.subr.bf16.mxu1 %v5361_v48  ;;  %v5356_v41 = vcombine.low %v3500_v35, %v3504_v36  ;;  %v5357_v43 = vcombine.high %v3500_v35, %v3504_v36  ;;  %v5358_v48 = vcombine.low %v3501_v44, %v3505_v47  ;;  %v3540_v35 = vld [vmem:[%s8105_s8 + $0x150] sm:$0xff] }
 0x3f1   :  { %3980 = vmatpush1.bf16.msra.mxu0 %v5410_v39  ;;  %v3544_v36 = vld [vmem:[%s8105_s8 + $0x170] sm:$0xff]  ;;  %v3541_v39 = vld [vmem:[%s8105_s8 + $0x158] sm:$0xff] }
 0x3f2   :  { %4047 = vmatprep.subr.bf16.mxu0 %v5359_v49  ;;  %v5397_v44 = vcombine.high %v3540_v35, %v3544_v36  ;;  %v5399_v47 = vcombine.high %v3541_v39, %v3545_v40  ;;  %v3552_v49 = vld [vmem:[%s8105_s8 + $0x1b0] sm:$0xff] }
 0x3f3   :  { %3927 = vmatpush1.bf16.msra.mxu1 %v5360_v55 }
 0x3f4   :  { %3928 = vmatprep.subr.bf16.mxu1 %v5369_v57 }
 0x3f7   :  { %3929 = vmatpush1.bf16.msra.mxu1 %v5368_v63 }
 0x3f8   :  { %3930 = vmatprep.subr.bf16.mxu1 %v5377_v25  ;;  %v5351_v25 = vld [vmem:[%s8107_s7] ss:$0 sm:$0xff] }
 0x3fb   :  { %3931 = vmatpush1.bf16.msra.mxu1 %v5376_v42  ;;  %v3513_v42 = vld [vmem:[%s8105_s8 + $0x78] sm:$0xff] }
 0x3fc   :  { %3932 = vmatprep.subr.bf16.mxu1 %v5385_v37  ;;  %v5366_v11 = vcombine.low %v3509_v33, %v3513_v42 }
 0x3ff   :  { %3933 = vmatpush1.bf16.msra.mxu1 %v5384_v5  ;;  %v5367_v5 = vcombine.high %v3509_v33, %v3513_v42  ;;  %v6340_v33 = vld [vmem:[%s8106_s10 + $0xc8] sm:$0xff]  }
 0x400   :  { %3934 = vmatprep.subr.bf16.mxu1 %v5393_v10  ;;  %v5364_v10 = vcombine.low %v3508_v2, %v3512_v3  ;;  %v6338_v2 = vld [vmem:[%s8106_s10 + $0x80] sm:$0xff]   ;;  %v6339_v3 = vld [vmem:[%s8106_s10 + $0x48] sm:$0xff]  }
 0x401   :  { %v6341_v42 = vld [vmem:[%s8106_s10 + $0x8] sm:$0xff]  }
 0x403   :  { %3935 = vmatpush1.bf16.msra.mxu1 %v5392_v12  ;;  %v5373_v12 = vcombine.high %v3516_v6, %v3520_v7 }
 0x404   :  { %3936 = vmatprep.subr.bf16.mxu1 %v5401_v18  ;;  %v5372_v18 = vcombine.low %v3516_v6, %v3520_v7  ;;  %v6346_v6 = vld [vmem:[%s8106_s10 + $0x90] sm:$0xff]   ;;  %v6347_v7 = vld [vmem:[%s8106_s10 + $0x58] sm:$0xff]  }
 0x407   :  { %3937 = vmatpush1.bf16.msra.mxu1 %v5400_v23  ;;  %v5381_v23 = vcombine.high %v3524_v45, %v3528_v15  ;;  %v6354_v45 = vld [vmem:[%s8106_s10 + $0xa0] sm:$0xff]   ;;  %v6355_v15 = vld [vmem:[%s8106_s10 + $0x68] sm:$0xff]  }
 0x408   :  { %3938 = vmatprep.subr.bf16.mxu1 %v5409_v31  ;;  %v5389_v31 = vcombine.high %v3532_v28, %v3536_v29 }
 0x40b   :  { %3939 = vmatpush1.bf16.msra.mxu1 %v5408_v30  ;;  %v5382_v30 = vcombine.low %v3525_v16, %v3529_v17  ;;  %v6356_v16 = vld [vmem:[%s8106_s10 + $0xe8] sm:$0xff]  }
 0x40c   :  { %4006 = vmatprep.subr.bf16.mxu1 %v5357_v43  ;;  %v6357_v17 = vld [vmem:[%s8106_s10 + $0x28] sm:$0xff]  }
 0x4a1   :  { %v5547_v50 = vpop.f32.mrb[8].mxu1 }
 0x4a2   :  { %v5548_v51 = vpop.f32.mrb[9].mxu1 }
 0x4a3   :  { %v5549_v52 = vadd.f32 %v5548_v51, %v5547_v50  ;;  %v5550_v54 = vpop.f32.mrb[10].mxu1  ;;  %v3549_v50 = vld [vmem:[%s8105_s8 + $0x198] sm:$0xff] }
 0x4a4   :  { %v5551_v61 = vpop.f32.mrb[11].mxu1  ;;  %v3553_v51 = vld [vmem:[%s8105_s8 + $0x1b8] sm:$0xff]  ;;  %v5398_v54 = vcombine.low %v3541_v39, %v3545_v40 }
 0x4a7   :  { %v5591_v13 = vpop.f32.mrb[16].mxu0 }
 0x4a8   :  { %v5592_v55 = vpop.f32.mrb[17].mxu0 }
 0x4a9   :  { %v5593_v56 = vadd.f32 %v5592_v55, %v5591_v13  ;;  %v5594_v57 = vpop.f32.mrb[18].mxu0  ;;  %v5407_v13 = vcombine.high %v3549_v50, %v3553_v51  ;;  %v3556_v55 = vld [vmem:[%s8105_s8 + $0x1d0] sm:$0xff] }
 0x4aa   :  { %v5595_v58 = vpop.f32.mrb[19].mxu0  ;;  %v3557_v57 = vld [vmem:[%s8105_s8 + $0x1d8] sm:$0xff] }
 0x4ab   :  { %v3561_v58 = vld [vmem:[%s8105_s8 + $0x1f8] sm:$0xff] }
 0x4c1   :  { %v5569_v62 = vpop.f32.mrb[12].mxu1 }
 0x4c2   :  { %v5570_v24 = vpop.f32.mrb[13].mxu1 }
 0x4c3   :  { %v5571_v59 = vadd.f32 %v5570_v24, %v5569_v62  ;;  %v5572_v60 = vpop.f32.mrb[14].mxu1  ;;  %v5406_v24 = vcombine.low %v3549_v50, %v3553_v51 }
 0x4c4   :  { %v5573_v63 = vpop.f32.mrb[15].mxu1  ;;  %v5415_v60 = vcombine.high %v3557_v57, %v3561_v58 }
 0x4c5   :  { %v3305_v0 = vadd.f32 %v5571_v59, %v5549_v52  ;;  %v5396_v52 = vcombine.low %v3540_v35, %v3544_v36  ;;  %v7983_v35 = vld [vmem:[%s8108_s9] sm:$0xff]  ;;  %v3578_v36 = vsub.s32 3, %v7225_v20 }
 0x4c6   :  { %v3567_v39 = vrot.slane %v7983_v35, %v7228_v21 }
 0x4c7   :  { %v3487_v32 = vadd.f32 %v5593_v56, %v3305_v0  ;;  %v3560_v56 = vld [vmem:[%s8105_s8 + $0x1f0] sm:$0xff]  ;;  %v5414_v0 = vcombine.low %v3557_v57, %v3561_v58 }
 0x4c8   :  { %v5413_v59 = vcombine.high %v3556_v55, %v3560_v56  ;;  %v5412_v63 = vcombine.low %v3556_v55, %v3560_v56 }
 0x4c9   :  { %v3495_v1 = vadd.f32 %v5351_v25, %v3487_v32  ;;  %v6335_v25 = vld [vmem:[%s8106_s10 + $0x40] sm:$0xff]  }
 0x4ca   :  { %v6336_v32 = vld [vmem:[%s8106_s10 + $0xc0] sm:$0xff]  }
 0x4cb   :  { %v3496_v14 = vmax.f32 %v3495_v1, 0.0  ;;  %v6337_v1 = vld [vmem:[%s8106_s10] sm:$0xff]  }
 0x4cd   :  { %v7797_v37 = vpack.c.bf16 %v3496_v14, %v3496_v14  ;;  %v6342_v14 = vld [vmem:[%s8106_s10 + $0x88] sm:$0xff]  }
 0x4cf   :  { %3957 = vmatmul.mubr.bf16.vlgmr.msra.gmra.mrb[16].mxu1 %v7797_v37  ;;  %3998 = vmatmul.mubr.bf16.vlgmr.msra.gmra.mrb[20].mxu0 %v7797_v37 }
 0x4d0   :  { %4007 = vmatpush1.bf16.msra.mxu1 %v5356_v41  ;;  %4048 = vmatpush1.bf16.msra.mxu0 %v5358_v48  ;;  %v5388_v41 = vcombine.low %v3532_v28, %v3536_v29  ;;  %v3548_v48 = vld [vmem:[%s8105_s8 + $0x190] sm:$0xff]  ;;  %v6363_v29 = vld [vmem:[%s8106_s10 + $0x78] sm:$0xff]  }
 0x4d1   :  { %4008 = vmatprep.subr.bf16.mxu1 %v5365_v4  ;;  %4049 = vmatprep.subr.bf16.mxu0 %v5367_v5  ;;  %v5405_v61 = vcombine.high %v3548_v48, %v3552_v49  ;;  %v5404_v62 = vcombine.low %v3548_v48, %v3552_v49  ;;  %v6343_v4 = vld [vmem:[%s8106_s10 + $0x50] sm:$0xff]  }
 0x4d2   :  { %4038 = vmatprep.mubr.bf16.mxu1 %v6403_v22  ;;  %4079 = vmatprep.mubr.bf16.mxu0 %v6403_v22  ;;  %v3533_v22 = vld [vmem:[%s8105_s8 + $0x118] sm:$0xff]  ;;  %v6345_v5 = vld [vmem:[%s8106_s10 + $0x10] sm:$0xff]  }
 0x4d3   :  { %v5391_v34 = vcombine.high %v3533_v22, %v3537_v46  ;;  %v5390_v43 = vcombine.low %v3533_v22, %v3537_v46  ;;  %v6362_v28 = vld [vmem:[%s8106_s10 + $0xb0] sm:$0xff]   ;;  %v6364_v22 = vld [vmem:[%s8106_s10 + $0xf8] sm:$0xff]  }
 0x4d4   :  { %4009 = vmatpush1.bf16.msra.mxu1 %v5364_v10  ;;  %4050 = vmatpush1.bf16.msra.mxu0 %v5366_v11  ;;  %v6350_v10 = vld [vmem:[%s8106_s10 + $0x98] sm:$0xff]   ;;  %v6351_v11 = vld [vmem:[%s8106_s10 + $0x60] sm:$0xff]  }
 0x4d5   :  { %4010 = vmatprep.subr.bf16.mxu1 %v5373_v12  ;;  %4051 = vmatprep.subr.bf16.mxu0 %v5375_v38  ;;  %v6352_v12 = vld [vmem:[%s8106_s10 + $0xe0] sm:$0xff]   ;;  %v6365_v46 = vld [vmem:[%s8106_s10 + $0x38] sm:$0xff]  }
 0x4d6   :  { %v6353_v38 = vld [vmem:[%s8106_s10 + $0x20] sm:$0xff]  }
 0x4d8   :  { %4011 = vmatpush1.bf16.msra.mxu1 %v5372_v18  ;;  %4052 = vmatpush1.bf16.msra.mxu0 %v5374_v19  ;;  %v6358_v18 = vld [vmem:[%s8106_s10 + $0xa8] sm:$0xff]   ;;  %v6359_v19 = vld [vmem:[%s8106_s10 + $0x70] sm:$0xff]  }
 0x4d9   :  { %4012 = vmatprep.subr.bf16.mxu1 %v5381_v23  ;;  %4053 = vmatprep.subr.bf16.mxu0 %v5383_v27  ;;  %v6360_v23 = vld [vmem:[%s8106_s10 + $0xf0] sm:$0xff]  }
 0x4da   :  { %v6361_v27 = vld [vmem:[%s8106_s10 + $0x30] sm:$0xff]  }
 0x4dc   :  { %4013 = vmatpush1.bf16.msra.mxu1 %v5380_v53  ;;  %4054 = vmatpush1.bf16.msra.mxu0 %v5382_v30  ;;  %v6366_v53 = vld [vmem:[%s8106_s10 + $0xb8] sm:$0xff]   ;;  %v6367_v30 = vld [vmem:[%s8106_s10 + $0x140] sm:$0xff]  }
 0x4dd   :  { %4014 = vmatprep.subr.bf16.mxu1 %v5389_v31  ;;  %4055 = vmatprep.subr.bf16.mxu0 %v5391_v34  ;;  %v6368_v31 = vld [vmem:[%s8106_s10 + $0x1c0] sm:$0xff]   ;;  %v3574_v34 = vsub.s32 2, %v7225_v20 }
 0x4df   :  { %v3575_v40 = vrot.slane %v7983_v35, %v3574_v34 }
 0x4e0   :  { %4015 = vmatpush1.bf16.msra.mxu1 %v5388_v41  ;;  %4056 = vmatpush1.bf16.msra.mxu0 %v5390_v43  ;;  %v3571_v41 = vrot.slane %v7983_v35, %v7234_v26  ;;  %v3579_v43 = vrot.slane %v7983_v35, %v3578_v36 }
 0x4e1   :  { %4016 = vmatprep.subr.bf16.mxu1 %v5397_v44  ;;  %4057 = vmatprep.subr.bf16.mxu0 %v5399_v47 }
 0x4e4   :  { %4017 = vmatpush1.bf16.msra.mxu1 %v5396_v52  ;;  %4058 = vmatpush1.bf16.msra.mxu0 %v5398_v54 }
 0x4e5   :  { %4018 = vmatprep.subr.bf16.mxu1 %v5405_v61  ;;  %4059 = vmatprep.subr.bf16.mxu0 %v5407_v13 }
 0x4e8   :  { %4019 = vmatpush1.bf16.msra.mxu1 %v5404_v62  ;;  %4060 = vmatpush1.bf16.msra.mxu0 %v5406_v24 }
 0x4e9   :  { %4020 = vmatprep.subr.bf16.mxu1 %v5413_v59  ;;  %4061 = vmatprep.subr.bf16.mxu0 %v5415_v60  ;;  %v6369_v59 = vld [vmem:[%s8106_s10 + $0x100] sm:$0xff]  }
 0x4ea   :  { %v6370_v60 = vld [vmem:[%s8106_s10 + $0x180] sm:$0xff]  }
 0x4ec   :  { %4021 = vmatpush1.bf16.msra.mxu1 %v5412_v63  ;;  %4062 = vmatpush1.bf16.msra.mxu0 %v5414_v0 }
 0x4ed   :  { %5597 = vmatprep.subr.bf16.mxu1 %v6335_v25  ;;  %5619 = vmatprep.subr.bf16.mxu0 %v6336_v32  ;;  %v6371_v25 = vld [vmem:[%s8106_s10 + $0x148] sm:$0xff]  }
 0x4ee   :  { %v6372_v32 = vld [vmem:[%s8106_s10 + $0x1c8] sm:$0xff]  }
 0x4ef   :  { %4039 = vmatmul.mubr.bf16.vlgmr.msra.gmra.mrb[20].mxu1 %v7797_v37  ;;  %4080 = vmatmul.mubr.bf16.vlgmr.msra.gmra.mrb[24].mxu0 %v7797_v37  ;;  %v6344_v37 = vld [vmem:[%s8106_s10 + $0xd0] sm:$0xff]  }
 0x4f0   :  { %5598 = vmatpush3.bf16.msra.mxu1 %v6337_v1  ;;  %5620 = vmatpush3.bf16.msra.mxu0 %v6338_v2  ;;  %v6373_v1 = vld [vmem:[%s8106_s10 + $0x108] sm:$0xff]  }
 0x4f1   :  { %5599 = vmatprep.subr.bf16.mxu1 %v6339_v3  ;;  %5621 = vmatprep.subr.bf16.mxu0 %v6340_v33  ;;  %v6374_v2 = vld [vmem:[%s8106_s10 + $0x188] sm:$0xff]   ;;  %v6375_v3 = vld [vmem:[%s8106_s10 + $0x150] sm:$0xff]  }
 0x4f2   :  { %v6376_v33 = vld [vmem:[%s8106_s10 + $0x1d0] sm:$0xff]  }
 0x4f4   :  { %5600 = vmatpush3.bf16.msra.mxu1 %v6341_v42  ;;  %5622 = vmatpush3.bf16.msra.mxu0 %v6342_v14  ;;  %v6377_v42 = vld [vmem:[%s8106_s10 + $0x110] sm:$0xff]  }
 0x4f5   :  { %5601 = vmatprep.subr.bf16.mxu1 %v6343_v4  ;;  %5623 = vmatprep.subr.bf16.mxu0 %v6344_v37  ;;  %v6378_v14 = vld [vmem:[%s8106_s10 + $0x190] sm:$0xff]   ;;  %v6379_v4 = vld [vmem:[%s8106_s10 + $0x158] sm:$0xff]  }
 0x4f6   :  { %v6380_v37 = vld [vmem:[%s8106_s10 + $0x1d8] sm:$0xff]  }
 0x4f8   :  { %5602 = vmatpush3.bf16.msra.mxu1 %v6345_v5  ;;  %5624 = vmatpush3.bf16.msra.mxu0 %v6346_v6  ;;  %v6381_v5 = vld [vmem:[%s8106_s10 + $0x118] sm:$0xff]  }
 0x4f9   :  { %5603 = vmatprep.subr.bf16.mxu1 %v6347_v7  ;;  %5625 = vmatprep.subr.bf16.mxu0 %v6348_v8  ;;  %v6382_v6 = vld [vmem:[%s8106_s10 + $0x198] sm:$0xff]   ;;  %v6383_v7 = vld [vmem:[%s8106_s10 + $0x160] sm:$0xff]  }
 0x4fa   :  { %v6384_v8 = vld [vmem:[%s8106_s10 + $0x1e0] sm:$0xff]  }
 0x4fc   :  { %5604 = vmatpush3.bf16.msra.mxu1 %v6349_v9  ;;  %5626 = vmatpush3.bf16.msra.mxu0 %v6350_v10  ;;  %v6385_v9 = vld [vmem:[%s8106_s10 + $0x120] sm:$0xff]  }
 0x4fd   :  { %5605 = vmatprep.subr.bf16.mxu1 %v6351_v11  ;;  %5627 = vmatprep.subr.bf16.mxu0 %v6352_v12  ;;  %v6386_v10 = vld [vmem:[%s8106_s10 + $0x1a0] sm:$0xff]   ;;  %v6387_v11 = vld [vmem:[%s8106_s10 + $0x168] sm:$0xff]  }
 0x4fe   :  { %v6388_v12 = vld [vmem:[%s8106_s10 + $0x1e8] sm:$0xff]  }
 0x500   :  { %5606 = vmatpush3.bf16.msra.mxu1 %v6353_v38  ;;  %5628 = vmatpush3.bf16.msra.mxu0 %v6354_v45  ;;  %v3582_v38 = vsub.s32 4, %v7225_v20  ;;  %v3590_v45 = vsub.s32 6, %v7225_v20 }
 0x501   :  { %5607 = vmatprep.subr.bf16.mxu1 %v6355_v15  ;;  %5629 = vmatprep.subr.bf16.mxu0 %v6356_v16  ;;  %v6389_v15 = vld [vmem:[%s8106_s10 + $0x128] sm:$0xff]  }
 0x502   :  { %v6390_v16 = vld [vmem:[%s8106_s10 + $0x1a8] sm:$0xff]  }
 0x504   :  { %5608 = vmatpush3.bf16.msra.mxu1 %v6357_v17  ;;  %5630 = vmatpush3.bf16.msra.mxu0 %v6358_v18  ;;  %v3586_v17 = vsub.s32 5, %v7225_v20  ;;  %v3594_v18 = vsub.s32 7, %v7225_v20 }
 0x505   :  { %5609 = vmatprep.subr.bf16.mxu1 %v6359_v19  ;;  %5631 = vmatprep.subr.bf16.mxu0 %v6360_v23  ;;  %v6391_v19 = vld [vmem:[%s8106_s10 + $0x170] sm:$0xff]  }
 0x506   :  { %v6392_v23 = vld [vmem:[%s8106_s10 + $0x1f0] sm:$0xff]   ;;  %v3595_v20 = vrot.slane %v7983_v35, %v3594_v18 }
 0x508   :  { %5610 = vmatpush3.bf16.msra.mxu1 %v6361_v27  ;;  %5632 = vmatpush3.bf16.msra.mxu0 %v6362_v28  ;;  %v3583_v27 = vrot.slane %v7983_v35, %v3582_v38  ;;  %v3591_v28 = vrot.slane %v7983_v35, %v3590_v45 }
 0x509   :  { %5611 = vmatprep.subr.bf16.mxu1 %v6363_v29  ;;  %5633 = vmatprep.subr.bf16.mxu0 %v6364_v22  ;;  %v3587_v29 = vrot.slane %v7983_v35, %v3586_v17  ;;  %v6393_v22 = vld [vmem:[%s8106_s10 + $0x130] sm:$0xff]  }
 0x50c   :  { %5612 = vmatpush3.bf16.msra.mxu1 %v6365_v46  ;;  %5634 = vmatpush3.bf16.msra.mxu0 %v6366_v53  ;;  %v6394_v46 = vld [vmem:[%s8106_s10 + $0x1b0] sm:$0xff]   ;;  %v6395_v53 = vld [vmem:[%s8106_s10 + $0x178] sm:$0xff]  }
 0x50d   :  { %5641 = vmatprep.subr.bf16.mxu1 %v6367_v30  ;;  %5663 = vmatprep.subr.bf16.mxu0 %v6368_v31  ;;  %v6396_v30 = vld [vmem:[%s8106_s10 + $0x1f8] sm:$0xff]  }
 0x5a2   :  { %v3958_v44 = vpop.f32.mrb[16].mxu1  ;;  %v3999_v47 = vpop.f32.mrb[20].mxu0 }
 0x5a3   :  { %v3959_v48 = vadd.f32 %v3958_v44, %v3567_v39  ;;  %v4000_v49 = vadd.f32 %v3999_v47, %v3575_v40  ;;  %v3960_v50 = vpop.f32.mrb[17].mxu1  ;;  %v4001_v51 = vpop.f32.mrb[21].mxu0 }
 0x5a4   :  { %v3961_v52 = vadd.f32 %v3960_v50, %v3571_v41  ;;  %v4002_v54 = vadd.f32 %v4001_v51, %v3579_v43  ;;  %v3962_v61 = vpop.f32.mrb[18].mxu1  ;;  %v4003_v13 = vpop.f32.mrb[22].mxu0 }
 0x5a5   :  { %v4088_v55 = vmax.f32 %v3959_v48, 0.0  ;;  %v4090_v56 = vmax.f32 %v4000_v49, 0.0  ;;  %v3963_v21 = vpop.f32.mrb[19].mxu1  ;;  %v4004_v57 = vpop.f32.mrb[23].mxu0  ;;  %v6397_v48 = vld [vmem:[%s8106_s10 + $0x138] sm:$0xff]  }
 0x5a6   :  { %v4089_v58 = vmax.f32 %v3961_v52, 0.0  ;;  %v4091_v62 = vmax.f32 %v4002_v54, 0.0  ;;  %v6398_v49 = vld [vmem:[%s8106_s10 + $0x1b8] sm:$0xff]  }
 0x5a7   :  { %v5523_v63 = vpack.c.bf16 %v4088_v55, %v4088_v55  ;;  %v5525_v0 = vpack.c.bf16 %v4090_v56, %v4090_v56 }
 0x5a8   :  { %v5524_v24 = vpack.c.bf16 %v4089_v58, %v4089_v58  ;;  %v5526_v26 = vpack.c.bf16 %v4091_v62, %v4091_v62 }
 0x5aa   :  { %4715 = vmatprep.mubr.bf16.mxu1 %v5524_v24  ;;  %4755 = vmatprep.mubr.bf16.mxu0 %v5526_v26  ;;  %v5420_v24 = vld [vmem:[%s8109_s11] ss:$0 sm:$0xff]  ;;  %s6404_s11 = smov 127  }
 0x5ab   :  { %4716 = vmatmul.mubr.bf16.vlgmr.msra.gmra.mrb[24].mxu1 %v5523_v63  ;;  %4756 = vmatmul.mubr.bf16.vlgmr.msra.gmra.mrb[28].mxu0 %v5525_v0 }
 0x5ac   :  { %5642 = vmatpush3.bf16.msra.mxu1 %v6369_v59  ;;  %5664 = vmatpush3.bf16.msra.mxu0 %v6370_v60 }
 0x5ad   :  { %5643 = vmatprep.subr.bf16.mxu1 %v6371_v25  ;;  %5665 = vmatprep.subr.bf16.mxu0 %v6372_v32 }
 0x5b0   :  { %5644 = vmatpush3.bf16.msra.mxu1 %v6373_v1  ;;  %5666 = vmatpush3.bf16.msra.mxu0 %v6374_v2 }
 0x5b1   :  { %5645 = vmatprep.subr.bf16.mxu1 %v6375_v3  ;;  %5667 = vmatprep.subr.bf16.mxu0 %v6376_v33 }
 0x5b4   :  { %5646 = vmatpush3.bf16.msra.mxu1 %v6377_v42  ;;  %5668 = vmatpush3.bf16.msra.mxu0 %v6378_v14 }
 0x5b5   :  { %5647 = vmatprep.subr.bf16.mxu1 %v6379_v4  ;;  %5669 = vmatprep.subr.bf16.mxu0 %v6380_v37 }
 0x5b8   :  { %5648 = vmatpush3.bf16.msra.mxu1 %v6381_v5  ;;  %5670 = vmatpush3.bf16.msra.mxu0 %v6382_v6 }
 0x5b9   :  { %5649 = vmatprep.subr.bf16.mxu1 %v6383_v7  ;;  %5671 = vmatprep.subr.bf16.mxu0 %v6384_v8 }
 0x5bc   :  { %5650 = vmatpush3.bf16.msra.mxu1 %v6385_v9  ;;  %5672 = vmatpush3.bf16.msra.mxu0 %v6386_v10 }
 0x5bd   :  { %5651 = vmatprep.subr.bf16.mxu1 %v6387_v11  ;;  %5673 = vmatprep.subr.bf16.mxu0 %v6388_v12 }
 0x5c0   :  { %5652 = vmatpush3.bf16.msra.mxu1 %v6389_v15  ;;  %5674 = vmatpush3.bf16.msra.mxu0 %v6390_v16 }
 0x5c1   :  { %5653 = vmatprep.subr.bf16.mxu1 %v6391_v19  ;;  %5675 = vmatprep.subr.bf16.mxu0 %v6392_v23 }
 0x5c2   :  { %v4040_v31 = vpop.f32.mrb[20].mxu1  ;;  %v4081_v34 = vpop.f32.mrb[24].mxu0 }
 0x5c3   :  { %v4041_v35 = vadd.f32 %v4040_v31, %v3583_v27  ;;  %v4082_v36 = vadd.f32 %v4081_v34, %v3591_v28  ;;  %v4042_v39 = vpop.f32.mrb[21].mxu1  ;;  %v4083_v40 = vpop.f32.mrb[25].mxu0 }
 0x5c4   :  { %v4043_v41 = vadd.f32 %v4042_v39, %v3587_v29  ;;  %v4084_v43 = vadd.f32 %v4083_v40, %v3595_v20  ;;  %v4044_v44 = vpop.f32.mrb[22].mxu1  ;;  %v4085_v47 = vpop.f32.mrb[26].mxu0  ;;  %5654 = vmatpush3.bf16.msra.mxu1 %v6393_v22  ;;  %5676 = vmatpush3.bf16.msra.mxu0 %v6394_v46 }
 0x5c5   :  { %v4092_v50 = vmax.f32 %v4041_v35, 0.0  ;;  %v4094_v51 = vmax.f32 %v4082_v36, 0.0  ;;  %v4045_v52 = vpop.f32.mrb[23].mxu1  ;;  %v4086_v54 = vpop.f32.mrb[27].mxu0  ;;  %5655 = vmatprep.subr.bf16.mxu1 %v6395_v53  ;;  %5677 = vmatprep.subr.bf16.mxu0 %v6396_v30 }
 0x5c6   :  { %v4093_v61 = vmax.f32 %v4043_v41, 0.0  ;;  %v4095_v13 = vmax.f32 %v4084_v43, 0.0 }
 0x5c7   :  { %v5527_v21 = vpack.c.bf16 %v4092_v50, %v4092_v50  ;;  %v5529_v57 = vpack.c.bf16 %v4094_v51, %v4094_v51 }
 0x5c8   :  { %v5528_v55 = vpack.c.bf16 %v4093_v61, %v4093_v61  ;;  %v5530_v56 = vpack.c.bf16 %v4095_v13, %v4095_v13  ;;  %5656 = vmatpush3.bf16.msra.mxu1 %v6397_v48  ;;  %5678 = vmatpush3.bf16.msra.mxu0 %v6398_v49 }
 0x5ca   :  { %4795 = vmatprep.mubr.bf16.mxu1 %v5528_v55  ;;  %4835 = vmatprep.mubr.bf16.mxu0 %v5530_v56 }
 0x5cb   :  { %4796 = vmatmul.mubr.bf16.vlgmr.msra.gmra.mrb[28].mxu1 %v5527_v21  ;;  %4836 = vmatmul.mubr.bf16.vlgmr.msra.gmra.mrb[32].mxu0 %v5529_v57 }
 0x67e   :  { %v5613_v58 = vpop.f32.mrb[24].mxu1  ;;  %v5635_v62 = vpop.f32.mrb[28].mxu0 }
 0x67f   :  { %v5614_v26 = vpop.f32.mrb[25].mxu1  ;;  %v5636_v59 = vpop.f32.mrb[29].mxu0 }
 0x680   :  { %v5615_v60 = vadd.f32 %v5614_v26, %v5613_v58  ;;  %v5637_v63 = vadd.f32 %v5636_v59, %v5635_v62  ;;  %v5616_v0 = vpop.f32.mrb[26].mxu1  ;;  %v5638_v25 = vpop.f32.mrb[30].mxu0 }
 0x681   :  { %v5617_v32 = vpop.f32.mrb[27].mxu1  ;;  %v5639_v1 = vpop.f32.mrb[31].mxu0 }
 0x682   :  { %v4718_v2 = vadd.f32 %v5615_v60, %v5420_v24 }
 0x684   :  { %v4758_v3 = vadd.f32 %v5637_v63, %v4718_v2 }
 0x69e   :  { %v5657_v33 = vpop.f32.mrb[28].mxu1  ;;  %v5679_v42 = vpop.f32.mrb[32].mxu0 }
 0x69f   :  { %v5658_v14 = vpop.f32.mrb[29].mxu1  ;;  %v5680_v4 = vpop.f32.mrb[33].mxu0 }
 0x6a0   :  { %v5659_v37 = vadd.f32 %v5658_v14, %v5657_v33  ;;  %v5681_v5 = vadd.f32 %v5680_v4, %v5679_v42  ;;  %v5660_v6 = vpop.f32.mrb[30].mxu1  ;;  %v5682_v7 = vpop.f32.mrb[34].mxu0 }
 0x6a1   :  { %v5661_v8 = vpop.f32.mrb[31].mxu1  ;;  %v5683_v9 = vpop.f32.mrb[35].mxu0 }
 0x6a2   :  { %v4798_v10 = vadd.f32 %v5659_v37, %v4758_v3 }
 0x6a4   :  { %v4838_v11 = vadd.f32 %v5681_v5, %v4798_v10 }
 0x6a6   :  { %4855 = vperm.xlu1 %5797, %v4838_v11   ;;  %4844 = vrot.lane.b32.xlu0 %v4838_v11, %s6404_s11 }
 0x718   :  { %v4845_v12 = vpop.permute.xlu0 %4844 }
 0x719   :  { %v4848_v38 = vsel %vm4847_vm0, %v4845_v12, 0.0 }
 0x71a   :  { %4849 = vadd.xlane.f32.xlu0 %v4848_v38 }
 0x725   :  { %v4856_v17 = vpop.permute.xlu1 %4855 }
 0x7a7   :  { %v4850_v45 = vpop.xlane.xlu0 %4849 }
 0x7a8   :  { %v4852_v15 = vmul.f32 0.125, %v4850_v45 }
 0x7aa   :  { %v4853_v16 = vsub.f32 %v4838_v11, %v4852_v15 }
 0x7ac   :  { %v4858_v18 = vadd.f32 %v4856_v17, %v4853_v16 }
 0x7ae   :  { %v5493_v19 = vmul.f32 -1.442695, %v4858_v18 }
 0x7b0   :  { %6399 = vpow2.f32 %v5493_v19 }
 0x7ba   :  { %v6400_v23 = vpop.eup %6399 }
 0x7bb   :  { %v4862_v27 = vadd.f32 1.0, %v6400_v23 }
 0x7bd   :  { %6401 = vrcp.f32 %v4862_v27 }
 0x7c7   :  { %v6402_v28 = vpop.eup %6401 }
 0x7c8   :  { %4866 = vrot.lane.b32.xlu1 %v6402_v28, %s6404_s11 }
 0x83a   :  { %v4867_v29 = vpop.permute.xlu1 %4866 }
 0x83b   :  { %4869 = vst.msk [vmem:[%s8110_s12] sm:$0xff] %vm4847_vm0, %v4867_v29 }

</bundles_post_ra>
